<compile_context>
chip_gen: v7x
topology: tpu7x:2x2x1
jax: 0.10.0
libtpu: 0.0.40
codegen_flags: <defaults>
</compile_context>

<pallas_src>
import functools

import jax
import jax.numpy as jnp
from jax import lax
from jax.experimental import pallas as pl
from jax.experimental.pallas import tpu as pltpu

N_THINK = 15  # hard-coded "thinking" steps in the reference forward


def _pick_h_chunk(b_pad, hidden, budget_bytes=64 << 10):
    """Largest chunk of the H axis whose per-slab f32 size stays ~register-sized."""
    h_chunk = hidden
    while h_chunk % 2 == 0 and h_chunk > 128 and b_pad * h_chunk * 4 > budget_bytes:
        h_chunk //= 2
    return h_chunk


def simple_lstm_kernel(q_tok_ref, a_tok_ref, bias_ref, w_ih_ref, w_hh_ref,
                       w_prj_ref, out_ref, h_ref, c_ref, gates_ref, *, h_chunk):
    """q_tok_ref: (Q, B, 1)  int32 -- question token ids.
       a_tok_ref: (A-1, B, 1) int32 -- teacher-forced answer ids (row 0 unused).
       bias_ref:  (1, 4H) f32      -- b_ih + b_hh (broadcast in-kernel).
       w_ih_ref:  (V, 4H) bf16     -- W_ih^T (input weights).
       w_hh_ref:  (H, 4H) bf16     -- W_hh^T (recurrent weights).
       w_prj_ref: (H, V)  bf16     -- tgt_word_prj (bias=False).
       out_ref:   (A-1, B, V) f32  -- output_seq.
       h_ref/c_ref: (B, H) f32 VMEM scratch; gates_ref: (B, 4H) f32 scratch."""
    Q = q_tok_ref.shape[0]
    A1, B, V = out_ref.shape
    H = w_hh_ref.shape[0]
    n_chunks = H // h_chunk
    f32, bf16 = jnp.float32, jnp.bfloat16

    def onehot_x_gates(tok):
        # tok: (B, 1) int32.  one_hot(x) @ W_ih^T on the MXU == exact row gather
        # of the bf16 W_ih (f32 accumulation); V-contraction is tiny vs. H.
        iota = lax.broadcasted_iota(jnp.int32, (B, V), 1)
        onehot = jnp.where(iota == tok, 1.0, 0.0).astype(bf16)
        return jnp.dot(onehot, w_ih_ref[...], preferred_element_type=f32)

    def lstm_step(x_gates=None):
        # One fused (B, H) @ (H, 4H) MXU push into the VMEM gates scratch.
        hb = h_ref[...].astype(bf16)
        pre = bias_ref[...] + jnp.dot(hb, w_hh_ref[...],
                                      preferred_element_type=f32)
        if x_gates is not None:
            pre = pre + x_gates
        gates_ref[...] = pre
        # Chunked elementwise state update (PyTorch gate order i, f, g, o);
        # bounds the live vreg set at H=2048 / packed B.
        for ci in range(n_chunks):
            c0 = ci * h_chunk
            i_g = jax.nn.sigmoid(gates_ref[:, pl.ds(0 * H + c0, h_chunk)])
            f_g = jax.nn.sigmoid(gates_ref[:, pl.ds(1 * H + c0, h_chunk)])
            g_g = jnp.tanh(gates_ref[:, pl.ds(2 * H + c0, h_chunk)])
            o_g = jax.nn.sigmoid(gates_ref[:, pl.ds(3 * H + c0, h_chunk)])
            c_new = f_g * c_ref[:, pl.ds(c0, h_chunk)] + i_g * g_g
            c_ref[:, pl.ds(c0, h_chunk)] = c_new
            h_ref[:, pl.ds(c0, h_chunk)] = o_g * jnp.tanh(c_new)

    def project():
        return jnp.dot(h_ref[...].astype(bf16), w_prj_ref[...],
                       preferred_element_type=f32)

    # --- init state ---
    h_ref[...] = jnp.zeros_like(h_ref)
    c_ref[...] = jnp.zeros_like(c_ref)

    # --- question phase ---
    def q_body(t, carry):
        lstm_step(onehot_x_gates(q_tok_ref[t]))
        return carry
    lax.fori_loop(0, Q, q_body, 0)

    # Projection of the last question-step output == answer-step-0 logits.
    out_ref[0] = project()

    # --- thinking phase: x == 0, so gates = h @ W_hh + b (no W_ih push) ---
    def think_body(t, carry):
        lstm_step()
        return carry
    lax.fori_loop(0, N_THINK, think_body, 0)

    # --- answer phase, t == 0: feed the raw logits back through W_ih ---
    x0 = out_ref[0].astype(bf16)                       # (B, V)
    lstm_step(jnp.dot(x0, w_ih_ref[...], preferred_element_type=f32))

    # --- answer phase, t >= 1: project previous output, teacher-force as[t] ---
    def a_body(t, carry):
        out_ref[t] = project()
        lstm_step(onehot_x_gates(a_tok_ref[t]))
        return carry
    lax.fori_loop(1, A1, a_body, 0)


def simple_lstm_forward(batch_qs, batch_qs_pos, batch_as, batch_as_pos, params,
                        *, vocab_sz, num_hidden, max_answer_sz, max_question_sz):
    del batch_qs_pos, batch_as_pos  # unused in the reference forward
    B = batch_qs.shape[0]
    V, H = vocab_sz, num_hidden
    Q = max_question_sz
    A1 = max_answer_sz - 1
    assert Q >= 1 and A1 >= 1, "need at least one question step and one output"
    assert batch_qs.shape == (B, Q) and batch_as.shape == (B, max_answer_sz)
    f32, bf16 = jnp.float32, jnp.bfloat16

    # Batch packing/padding: pad to a multiple of 8 sublanes.  For production
    # throughput, pack many independent sequences along this axis toward the
    # MXU M tile (128 on v5e, 256 on v6e/v7x) -- rows are fully independent.
    B_pad = max(8, -(-B // 8) * 8)
    pad = B_pad - B
    qs = batch_qs.astype(jnp.int32)
    as_ = batch_as.astype(jnp.int32)
    if pad:
        qs = jnp.pad(qs, ((0, pad), (0, 0)))
        as_ = jnp.pad(as_, ((0, pad), (0, 0)))
    q_tok = qs.T[:, :, None]                    # (Q, B_pad, 1)
    a_tok = as_[:, 1:].T[:, :, None]            # (A-1, B_pad, 1), row 0 unused

    # Weight prep (plain-JAX glue): pre-transpose to (in, out); bf16 weights
    # for VMEM residency at the real H=2048, f32 MXU accumulation in-kernel.
    bias = (params["b_ih"] + params["b_hh"]).astype(f32)[None, :]   # (1, 4H)
    w_ih_bf = params["w_ih"].T.astype(bf16)                         # (V, 4H)
    w_hh_bf = params["w_hh"].T.astype(bf16)                         # (H, 4H)
    w_prj_bf = params["w_prj"].T.astype(bf16)                       # (H, V)

    h_chunk = _pick_h_chunk(B_pad, H)

    operands = (q_tok, a_tok, bias, w_ih_bf, w_hh_bf, w_prj_bf)
    scratch_bytes = (2 * B_pad * H + B_pad * 4 * H) * 4
    out_bytes = A1 * B_pad * V * 4
    resident = (sum(int(x.size) * x.dtype.itemsize for x in operands)
                + out_bytes + scratch_bytes)
    vmem_limit = int(resident * 1.3) + (8 << 20)    # + Mosaic scratch headroom

    kernel = functools.partial(simple_lstm_kernel, h_chunk=h_chunk)
    vmem = pl.BlockSpec(memory_space=pltpu.MemorySpace.VMEM)
    out_seq = pl.pallas_call(
        kernel,
        out_shape=jax.ShapeDtypeStruct((A1, B_pad, V), jnp.float32),
        in_specs=[vmem] * 6,
        out_specs=vmem,
        scratch_shapes=[pltpu.VMEM((B_pad, H), jnp.float32),
                        pltpu.VMEM((B_pad, H), jnp.float32),
                        pltpu.VMEM((B_pad, 4 * H), jnp.float32)],
        compiler_params=pltpu.CompilerParams(vmem_limit_bytes=vmem_limit),
    )(*operands)

    # Drop padded rows, then flatten (t, b) -> rows, same as the PyTorch return.
    return out_seq[:, :B, :].reshape(-1, V)


def simple_lstm_reference(batch_qs, batch_as, params, *, vocab_sz, num_hidden,
                          max_answer_sz, max_question_sz):
    """Pure-JAX mirror of the PyTorch forward using the same bf16-rounded
    weights as the kernel (f32 state & accumulation)."""
    V, H = vocab_sz, num_hidden
    A1 = max_answer_sz - 1
    B = batch_qs.shape[0]
    f32, bf16 = jnp.float32, jnp.bfloat16
    w_ih_bf = params["w_ih"].T.astype(bf16)      # (V, 4H)
    w_hh_bf = params["w_hh"].T.astype(bf16)      # (H, 4H)
    w_prj_bf = params["w_prj"].T.astype(bf16)    # (H, V)
    b = (params["b_ih"] + params["b_hh"]).astype(f32)

    def step(xg, h, c):
        gates = xg + jnp.dot(h.astype(bf16), w_hh_bf, preferred_element_type=f32)
        i = jax.nn.sigmoid(gates[:, :H])
        f = jax.nn.sigmoid(gates[:, H:2 * H])
        g = jnp.tanh(gates[:, 2 * H:3 * H])
        o = jax.nn.sigmoid(gates[:, 3 * H:])
        c = f * c + i * g
        return o * jnp.tanh(c), c

    h = jnp.zeros((B, H), f32)
    c = jnp.zeros((B, H), f32)
    qs_t = batch_qs.T
    as_t = batch_as[:, 1:].T
    for t in range(max_question_sz):
        h, c = step(w_ih_bf[qs_t[t]].astype(f32) + b, h, c)
    outputs = h
    for _ in range(N_THINK):
        h, c = step(b[None, :], h, c)
    outs = []
    out0 = jnp.dot(outputs.astype(bf16), w_prj_bf, preferred_element_type=f32)
    outs.append(out0)
    xg0 = jnp.dot(out0.astype(bf16), w_ih_bf, preferred_element_type=f32) + b
    h, c = step(xg0, h, c)
    for t in range(1, A1):
        outs.append(jnp.dot(h.astype(bf16), w_prj_bf, preferred_element_type=f32))
        h, c = step(w_ih_bf[as_t[t]].astype(f32) + b, h, c)
    return jnp.stack(outs, axis=0).reshape(-1, V)


if __name__ == "__main__":
    # Small shapes consistent with the module's forward.
    vocab_sz = 128
    max_question_sz = 8
    max_answer_sz = 9          # -> 8 answer/output steps
    num_hidden = 128           # module hardcodes 2048; scaled down for the demo
    batch = 6                  # exercises the pad-to-8-sublanes path

    key = jax.random.PRNGKey(0)
    kq, ka, k1, k2, k3, k4, k5 = jax.random.split(key, 7)

    batch_qs = jax.random.randint(kq, (batch, max_question_sz), 0, vocab_sz,
                                  dtype=jnp.int32)
    batch_as = jax.random.randint(ka, (batch, max_answer_sz), 0, vocab_sz,
                                  dtype=jnp.int32)
    batch_qs_pos = jnp.zeros_like(batch_qs)  # unused by forward
    batch_as_pos = jnp.zeros_like(batch_as)  # unused by forward

    bound = 1.0 / (num_hidden ** 0.5)
    u = lambda k, shape: jax.random.uniform(k, shape, jnp.float32, -bound, bound)
    params = {
        "w_ih": u(k1, (4 * num_hidden, vocab_sz)),
        "w_hh": u(k2, (4 * num_hidden, num_hidden)),
        "b_ih": u(k3, (4 * num_hidden,)),
        "b_hh": u(k4, (4 * num_hidden,)),
        "w_prj": u(k5, (vocab_sz, num_hidden)),   # tgt_word_prj (bias=False)
        # NOTE: q_to_a Linear exists in __init__ but is never used in forward.
    }

    out = simple_lstm_forward(
        batch_qs, batch_qs_pos, batch_as, batch_as_pos, params,
        vocab_sz=vocab_sz, num_hidden=num_hidden,
        max_answer_sz=max_answer_sz, max_question_sz=max_question_sz)
    out = jax.block_until_ready(out)

    expected_shape = ((max_answer_sz - 1) * batch, vocab_sz)
    assert out.shape == expected_shape, (out.shape, expected_shape)

    ref = simple_lstm_reference(
        batch_qs, batch_as, params, vocab_sz=vocab_sz, num_hidden=num_hidden,
        max_answer_sz=max_answer_sz, max_question_sz=max_question_sz)
    max_err = float(jnp.max(jnp.abs(out - ref)))
    assert jnp.allclose(out, ref, atol=2e-2, rtol=2e-2), max_err

    print("KERNEL_OK")
</pallas_src>

<mosaic_0001>
module attributes {stable_mosaic.version = 11 : i64} {
  func.func @simple_lstm_kernel(%arg0: memref<8x8x1xi32, #tpu.memory_space<vmem>>, %arg1: memref<8x8x1xi32, #tpu.memory_space<vmem>>, %arg2: memref<1x512xf32, #tpu.memory_space<vmem>>, %arg3: memref<128x512xbf16, #tpu.memory_space<vmem>>, %arg4: memref<128x512xbf16, #tpu.memory_space<vmem>>, %arg5: memref<128x128xbf16, #tpu.memory_space<vmem>>, %arg6: memref<8x8x128xf32, #tpu.memory_space<vmem>>, %arg7: memref<8x128xf32, #tpu.memory_space<vmem>>, %arg8: memref<8x128xf32, #tpu.memory_space<vmem>>, %arg9: memref<8x512xf32, #tpu.memory_space<vmem>>) attributes {dimension_semantics = [], scalar_prefetch = 0 : i64, scratch_operands = 3 : i64, tpu.core_type = #tpu.core_type<tc>} {
    %cst = arith.constant 0.000000e+00 : f32
    %0 = vector.broadcast %cst : f32 to vector<8x128xf32>
    %c0 = arith.constant 0 : index
    %c0_0 = arith.constant 0 : index
    %1 = vector.load %arg7[%c0, %c0_0] : memref<8x128xf32, #tpu.memory_space<vmem>>, vector<8x128xf32>
    tpu.vector_store %arg7[%c0, %c0_0], %0 {strides = array<i32>} : memref<8x128xf32, #tpu.memory_space<vmem>>, vector<8x128xf32>,
    %cst_1 = arith.constant 0.000000e+00 : f32
    %2 = vector.broadcast %cst_1 : f32 to vector<8x128xf32>
    %c0_2 = arith.constant 0 : index
    %c0_3 = arith.constant 0 : index
    %3 = vector.load %arg8[%c0_2, %c0_3] : memref<8x128xf32, #tpu.memory_space<vmem>>, vector<8x128xf32>
    tpu.vector_store %arg8[%c0_2, %c0_3], %2 {strides = array<i32>} : memref<8x128xf32, #tpu.memory_space<vmem>>, vector<8x128xf32>,
    %c0_i32 = arith.constant 0 : i32
    %c8_i32 = arith.constant 8 : i32
    %4 = arith.addi %c0_i32, %c8_i32 : i32
    %c1_i32 = arith.constant 1 : i32
    scf.for %arg10 = %c0_i32 to %4 step %c1_i32  : i32 {
      %56 = arith.index_cast %arg10 : i32 to index
      %c0_47 = arith.constant 0 : index
      %c0_48 = arith.constant 0 : index
      %57 = vector.load %arg0[%56, %c0_47, %c0_48] : memref<8x8x1xi32, #tpu.memory_space<vmem>>, vector<1x8x1xi32>
      %58 = vector.shape_cast %57 : vector<1x8x1xi32> to vector<8x1xi32>
      %59 = tpu.iota {dimensions = array<i32: 1>} : vector<8x128xi32>
      %60 = vector.broadcast %58 : vector<8x1xi32> to vector<8x128xi32>
      %61 = arith.cmpi eq, %59, %60 : vector<8x128xi32>
      %cst_49 = arith.constant 1.000000e+00 : f32
      %cst_50 = arith.constant 0.000000e+00 : f32
      %62 = vector.broadcast %cst_49 : f32 to vector<8x128xf32>
      %63 = vector.broadcast %cst_50 : f32 to vector<8x128xf32>
      %64 = arith.select %61, %62, %63 : vector<8x128xi1>, vector<8x128xf32>
      %65 = arith.truncf %64 : vector<8x128xf32> to vector<8x128xbf16>
      %c0_51 = arith.constant 0 : index
      %c0_52 = arith.constant 0 : index
      %66 = vector.load %arg3[%c0_51, %c0_52] : memref<128x512xbf16, #tpu.memory_space<vmem>>, vector<128x512xbf16>
      %cst_53 = arith.constant dense<0.000000e+00> : vector<8x512xf32>
      %67 = tpu.matmul %65, %66, %cst_53 {dimension_numbers = #tpu.dot_dimension_numbers<[1], [0], [0], [1], [0, 0, 1, 1], [], []>} : vector<8x128xbf16>, vector<128x512xbf16>, vector<8x512xf32> -> vector<8x512xf32>
      %c0_54 = arith.constant 0 : index
      %c0_55 = arith.constant 0 : index
      %68 = vector.load %arg7[%c0_54, %c0_55] : memref<8x128xf32, #tpu.memory_space<vmem>>, vector<8x128xf32>
      %69 = arith.truncf %68 : vector<8x128xf32> to vector<8x128xbf16>
      %c0_56 = arith.constant 0 : index
      %c0_57 = arith.constant 0 : index
      %70 = vector.load %arg2[%c0_56, %c0_57] : memref<1x512xf32, #tpu.memory_space<vmem>>, vector<1x512xf32>
      %c0_58 = arith.constant 0 : index
      %c0_59 = arith.constant 0 : index
      %71 = vector.load %arg4[%c0_58, %c0_59] : memref<128x512xbf16, #tpu.memory_space<vmem>>, vector<128x512xbf16>
      %cst_60 = arith.constant dense<0.000000e+00> : vector<8x512xf32>
      %72 = tpu.matmul %69, %71, %cst_60 {dimension_numbers = #tpu.dot_dimension_numbers<[1], [0], [0], [1], [0, 0, 1, 1], [], []>} : vector<8x128xbf16>, vector<128x512xbf16>, vector<8x512xf32> -> vector<8x512xf32>
      %73 = vector.broadcast %70 : vector<1x512xf32> to vector<8x512xf32>
      %74 = arith.addf %73, %72 : vector<8x512xf32>
      %75 = arith.addf %74, %67 : vector<8x512xf32>
      %c0_61 = arith.constant 0 : index
      %c0_62 = arith.constant 0 : index
      %76 = vector.load %arg9[%c0_61, %c0_62] : memref<8x512xf32, #tpu.memory_space<vmem>>, vector<8x512xf32>
      tpu.vector_store %arg9[%c0_61, %c0_62], %75 {strides = array<i32>} : memref<8x512xf32, #tpu.memory_space<vmem>>, vector<8x512xf32>,
      %c0_63 = arith.constant 0 : index
      %c0_64 = arith.constant 0 : index
      %77 = vector.load %arg9[%c0_63, %c0_64] : memref<8x512xf32, #tpu.memory_space<vmem>>, vector<8x128xf32>
      %78 = arith.negf %77 : vector<8x128xf32>
      %79 = math.exp %78 : vector<8x128xf32>
      %cst_65 = arith.constant 1.000000e+00 : f32
      %80 = vector.broadcast %cst_65 : f32 to vector<8x128xf32>
      %81 = arith.addf %80, %79 : vector<8x128xf32>
      %82 = arith.divf %80, %81 : vector<8x128xf32>
      %c0_66 = arith.constant 0 : index
      %c128_67 = arith.constant 128 : index
      %83 = vector.load %arg9[%c0_66, %c128_67] : memref<8x512xf32, #tpu.memory_space<vmem>>, vector<8x128xf32>
      %84 = arith.negf %83 : vector<8x128xf32>
      %85 = math.exp %84 : vector<8x128xf32>
      %cst_68 = arith.constant 1.000000e+00 : f32
      %86 = vector.broadcast %cst_68 : f32 to vector<8x128xf32>
      %87 = arith.addf %86, %85 : vector<8x128xf32>
      %88 = arith.divf %86, %87 : vector<8x128xf32>
      %c0_69 = arith.constant 0 : index
      %c256_70 = arith.constant 256 : index
      %89 = vector.load %arg9[%c0_69, %c256_70] : memref<8x512xf32, #tpu.memory_space<vmem>>, vector<8x128xf32>
      %90 = math.tanh %89 : vector<8x128xf32>
      %c0_71 = arith.constant 0 : index
      %c384_72 = arith.constant 384 : index
      %91 = vector.load %arg9[%c0_71, %c384_72] : memref<8x512xf32, #tpu.memory_space<vmem>>, vector<8x128xf32>
      %92 = arith.negf %91 : vector<8x128xf32>
      %93 = math.exp %92 : vector<8x128xf32>
      %cst_73 = arith.constant 1.000000e+00 : f32
      %94 = vector.broadcast %cst_73 : f32 to vector<8x128xf32>
      %95 = arith.addf %94, %93 : vector<8x128xf32>
      %96 = arith.divf %94, %95 : vector<8x128xf32>
      %c0_74 = arith.constant 0 : index
      %c0_75 = arith.constant 0 : index
      %97 = vector.load %arg8[%c0_74, %c0_75] : memref<8x128xf32, #tpu.memory_space<vmem>>, vector<8x128xf32>
      %98 = arith.mulf %88, %97 : vector<8x128xf32>
      %99 = arith.mulf %82, %90 : vector<8x128xf32>
      %100 = arith.addf %98, %99 : vector<8x128xf32>
      %c0_76 = arith.constant 0 : index
      %c0_77 = arith.constant 0 : index
      %101 = vector.load %arg8[%c0_76, %c0_77] : memref<8x128xf32, #tpu.memory_space<vmem>>, vector<8x128xf32>
      tpu.vector_store %arg8[%c0_76, %c0_77], %100 {strides = array<i32>} : memref<8x128xf32, #tpu.memory_space<vmem>>, vector<8x128xf32>,
      %102 = math.tanh %100 : vector<8x128xf32>
      %103 = arith.mulf %96, %102 : vector<8x128xf32>
      %c0_78 = arith.constant 0 : index
      %c0_79 = arith.constant 0 : index
      %104 = vector.load %arg7[%c0_78, %c0_79] : memref<8x128xf32, #tpu.memory_space<vmem>>, vector<8x128xf32>
      tpu.vector_store %arg7[%c0_78, %c0_79], %103 {strides = array<i32>} : memref<8x128xf32, #tpu.memory_space<vmem>>, vector<8x128xf32>,
    }
    %c8_i32_4 = arith.constant 8 : i32
    %c0_5 = arith.constant 0 : index
    %c0_6 = arith.constant 0 : index
    %5 = vector.load %arg7[%c0_5, %c0_6] : memref<8x128xf32, #tpu.memory_space<vmem>>, vector<8x128xf32>
    %6 = arith.truncf %5 : vector<8x128xf32> to vector<8x128xbf16>
    %c0_7 = arith.constant 0 : index
    %c0_8 = arith.constant 0 : index
    %7 = vector.load %arg5[%c0_7, %c0_8] : memref<128x128xbf16, #tpu.memory_space<vmem>>, vector<128x128xbf16>
    %cst_9 = arith.constant dense<0.000000e+00> : vector<8x128xf32>
    %8 = tpu.matmul %6, %7, %cst_9 {dimension_numbers = #tpu.dot_dimension_numbers<[1], [0], [0], [1], [0, 0, 1, 1], [], []>} : vector<8x128xbf16>, vector<128x128xbf16>, vector<8x128xf32> -> vector<8x128xf32>
    %c0_10 = arith.constant 0 : index
    %c0_11 = arith.constant 0 : index
    %c0_12 = arith.constant 0 : index
    %9 = vector.load %arg6[%c0_10, %c0_11, %c0_12] : memref<8x8x128xf32, #tpu.memory_space<vmem>>, vector<1x8x128xf32>
    %10 = vector.shape_cast %9 : vector<1x8x128xf32> to vector<8x128xf32>
    %11 = vector.shape_cast %8 : vector<8x128xf32> to vector<1x8x128xf32>
    tpu.vector_store %arg6[%c0_10, %c0_11, %c0_12], %11 {strides = array<i32>} : memref<8x8x128xf32, #tpu.memory_space<vmem>>, vector<1x8x128xf32>,
    %c0_i32_13 = arith.constant 0 : i32
    %c15_i32 = arith.constant 15 : i32
    %12 = arith.addi %c0_i32_13, %c15_i32 : i32
    %c1_i32_14 = arith.constant 1 : i32
    scf.for %arg10 = %c0_i32_13 to %12 step %c1_i32_14  : i32 {
      %c0_47 = arith.constant 0 : index
      %c0_48 = arith.constant 0 : index
      %56 = vector.load %arg7[%c0_47, %c0_48] : memref<8x128xf32, #tpu.memory_space<vmem>>, vector<8x128xf32>
      %57 = arith.truncf %56 : vector<8x128xf32> to vector<8x128xbf16>
      %c0_49 = arith.constant 0 : index
      %c0_50 = arith.constant 0 : index
      %58 = vector.load %arg2[%c0_49, %c0_50] : memref<1x512xf32, #tpu.memory_space<vmem>>, vector<1x512xf32>
      %c0_51 = arith.constant 0 : index
      %c0_52 = arith.constant 0 : index
      %59 = vector.load %arg4[%c0_51, %c0_52] : memref<128x512xbf16, #tpu.memory_space<vmem>>, vector<128x512xbf16>
      %cst_53 = arith.constant dense<0.000000e+00> : vector<8x512xf32>
      %60 = tpu.matmul %57, %59, %cst_53 {dimension_numbers = #tpu.dot_dimension_numbers<[1], [0], [0], [1], [0, 0, 1, 1], [], []>} : vector<8x128xbf16>, vector<128x512xbf16>, vector<8x512xf32> -> vector<8x512xf32>
      %61 = vector.broadcast %58 : vector<1x512xf32> to vector<8x512xf32>
      %62 = arith.addf %61, %60 : vector<8x512xf32>
      %c0_54 = arith.constant 0 : index
      %c0_55 = arith.constant 0 : index
      %63 = vector.load %arg9[%c0_54, %c0_55] : memref<8x512xf32, #tpu.memory_space<vmem>>, vector<8x512xf32>
      tpu.vector_store %arg9[%c0_54, %c0_55], %62 {strides = array<i32>} : memref<8x512xf32, #tpu.memory_space<vmem>>, vector<8x512xf32>,
      %c0_56 = arith.constant 0 : index
      %c0_57 = arith.constant 0 : index
      %64 = vector.load %arg9[%c0_56, %c0_57] : memref<8x512xf32, #tpu.memory_space<vmem>>, vector<8x128xf32>
      %65 = arith.negf %64 : vector<8x128xf32>
      %66 = math.exp %65 : vector<8x128xf32>
      %cst_58 = arith.constant 1.000000e+00 : f32
      %67 = vector.broadcast %cst_58 : f32 to vector<8x128xf32>
      %68 = arith.addf %67, %66 : vector<8x128xf32>
      %69 = arith.divf %67, %68 : vector<8x128xf32>
      %c0_59 = arith.constant 0 : index
      %c128_60 = arith.constant 128 : index
      %70 = vector.load %arg9[%c0_59, %c128_60] : memref<8x512xf32, #tpu.memory_space<vmem>>, vector<8x128xf32>
      %71 = arith.negf %70 : vector<8x128xf32>
      %72 = math.exp %71 : vector<8x128xf32>
      %cst_61 = arith.constant 1.000000e+00 : f32
      %73 = vector.broadcast %cst_61 : f32 to vector<8x128xf32>
      %74 = arith.addf %73, %72 : vector<8x128xf32>
      %75 = arith.divf %73, %74 : vector<8x128xf32>
      %c0_62 = arith.constant 0 : index
      %c256_63 = arith.constant 256 : index
      %76 = vector.load %arg9[%c0_62, %c256_63] : memref<8x512xf32, #tpu.memory_space<vmem>>, vector<8x128xf32>
      %77 = math.tanh %76 : vector<8x128xf32>
      %c0_64 = arith.constant 0 : index
      %c384_65 = arith.constant 384 : index
      %78 = vector.load %arg9[%c0_64, %c384_65] : memref<8x512xf32, #tpu.memory_space<vmem>>, vector<8x128xf32>
      %79 = arith.negf %78 : vector<8x128xf32>
      %80 = math.exp %79 : vector<8x128xf32>
      %cst_66 = arith.constant 1.000000e+00 : f32
      %81 = vector.broadcast %cst_66 : f32 to vector<8x128xf32>
      %82 = arith.addf %81, %80 : vector<8x128xf32>
      %83 = arith.divf %81, %82 : vector<8x128xf32>
      %c0_67 = arith.constant 0 : index
      %c0_68 = arith.constant 0 : index
      %84 = vector.load %arg8[%c0_67, %c0_68] : memref<8x128xf32, #tpu.memory_space<vmem>>, vector<8x128xf32>
      %85 = arith.mulf %75, %84 : vector<8x128xf32>
      %86 = arith.mulf %69, %77 : vector<8x128xf32>
      %87 = arith.addf %85, %86 : vector<8x128xf32>
      %c0_69 = arith.constant 0 : index
      %c0_70 = arith.constant 0 : index
      %88 = vector.load %arg8[%c0_69, %c0_70] : memref<8x128xf32, #tpu.memory_space<vmem>>, vector<8x128xf32>
      tpu.vector_store %arg8[%c0_69, %c0_70], %87 {strides = array<i32>} : memref<8x128xf32, #tpu.memory_space<vmem>>, vector<8x128xf32>,
      %89 = math.tanh %87 : vector<8x128xf32>
      %90 = arith.mulf %83, %89 : vector<8x128xf32>
      %c0_71 = arith.constant 0 : index
      %c0_72 = arith.constant 0 : index
      %91 = vector.load %arg7[%c0_71, %c0_72] : memref<8x128xf32, #tpu.memory_space<vmem>>, vector<8x128xf32>
      tpu.vector_store %arg7[%c0_71, %c0_72], %90 {strides = array<i32>} : memref<8x128xf32, #tpu.memory_space<vmem>>, vector<8x128xf32>,
    }
    %c0_15 = arith.constant 0 : index
    %c0_16 = arith.constant 0 : index
    %c0_17 = arith.constant 0 : index
    %13 = vector.load %arg6[%c0_15, %c0_16, %c0_17] : memref<8x8x128xf32, #tpu.memory_space<vmem>>, vector<1x8x128xf32>
    %14 = vector.shape_cast %13 : vector<1x8x128xf32> to vector<8x128xf32>
    %15 = arith.truncf %14 : vector<8x128xf32> to vector<8x128xbf16>
    %c0_18 = arith.constant 0 : index
    %c0_19 = arith.constant 0 : index
    %16 = vector.load %arg3[%c0_18, %c0_19] : memref<128x512xbf16, #tpu.memory_space<vmem>>, vector<128x512xbf16>
    %cst_20 = arith.constant dense<0.000000e+00> : vector<8x512xf32>
    %17 = tpu.matmul %15, %16, %cst_20 {dimension_numbers = #tpu.dot_dimension_numbers<[1], [0], [0], [1], [0, 0, 1, 1], [], []>} : vector<8x128xbf16>, vector<128x512xbf16>, vector<8x512xf32> -> vector<8x512xf32>
    %c0_21 = arith.constant 0 : index
    %c0_22 = arith.constant 0 : index
    %18 = vector.load %arg7[%c0_21, %c0_22] : memref<8x128xf32, #tpu.memory_space<vmem>>, vector<8x128xf32>
    %19 = arith.truncf %18 : vector<8x128xf32> to vector<8x128xbf16>
    %c0_23 = arith.constant 0 : index
    %c0_24 = arith.constant 0 : index
    %20 = vector.load %arg2[%c0_23, %c0_24] : memref<1x512xf32, #tpu.memory_space<vmem>>, vector<1x512xf32>
    %c0_25 = arith.constant 0 : index
    %c0_26 = arith.constant 0 : index
    %21 = vector.load %arg4[%c0_25, %c0_26] : memref<128x512xbf16, #tpu.memory_space<vmem>>, vector<128x512xbf16>
    %cst_27 = arith.constant dense<0.000000e+00> : vector<8x512xf32>
    %22 = tpu.matmul %19, %21, %cst_27 {dimension_numbers = #tpu.dot_dimension_numbers<[1], [0], [0], [1], [0, 0, 1, 1], [], []>} : vector<8x128xbf16>, vector<128x512xbf16>, vector<8x512xf32> -> vector<8x512xf32>
    %23 = vector.broadcast %20 : vector<1x512xf32> to vector<8x512xf32>
    %24 = arith.addf %23, %22 : vector<8x512xf32>
    %25 = arith.addf %24, %17 : vector<8x512xf32>
    %c0_28 = arith.constant 0 : index
    %c0_29 = arith.constant 0 : index
    %26 = vector.load %arg9[%c0_28, %c0_29] : memref<8x512xf32, #tpu.memory_space<vmem>>, vector<8x512xf32>
    tpu.vector_store %arg9[%c0_28, %c0_29], %25 {strides = array<i32>} : memref<8x512xf32, #tpu.memory_space<vmem>>, vector<8x512xf32>,
    %c0_30 = arith.constant 0 : index
    %c0_31 = arith.constant 0 : index
    %27 = vector.load %arg9[%c0_30, %c0_31] : memref<8x512xf32, #tpu.memory_space<vmem>>, vector<8x128xf32>
    %28 = arith.negf %27 : vector<8x128xf32>
    %29 = math.exp %28 : vector<8x128xf32>
    %cst_32 = arith.constant 1.000000e+00 : f32
    %30 = vector.broadcast %cst_32 : f32 to vector<8x128xf32>
    %31 = arith.addf %30, %29 : vector<8x128xf32>
    %32 = arith.divf %30, %31 : vector<8x128xf32>
    %c0_33 = arith.constant 0 : index
    %c128 = arith.constant 128 : index
    %33 = vector.load %arg9[%c0_33, %c128] : memref<8x512xf32, #tpu.memory_space<vmem>>, vector<8x128xf32>
    %34 = arith.negf %33 : vector<8x128xf32>
    %35 = math.exp %34 : vector<8x128xf32>
    %cst_34 = arith.constant 1.000000e+00 : f32
    %36 = vector.broadcast %cst_34 : f32 to vector<8x128xf32>
    %37 = arith.addf %36, %35 : vector<8x128xf32>
    %38 = arith.divf %36, %37 : vector<8x128xf32>
    %c0_35 = arith.constant 0 : index
    %c256 = arith.constant 256 : index
    %39 = vector.load %arg9[%c0_35, %c256] : memref<8x512xf32, #tpu.memory_space<vmem>>, vector<8x128xf32>
    %40 = math.tanh %39 : vector<8x128xf32>
    %c0_36 = arith.constant 0 : index
    %c384 = arith.constant 384 : index
    %41 = vector.load %arg9[%c0_36, %c384] : memref<8x512xf32, #tpu.memory_space<vmem>>, vector<8x128xf32>
    %42 = arith.negf %41 : vector<8x128xf32>
    %43 = math.exp %42 : vector<8x128xf32>
    %cst_37 = arith.constant 1.000000e+00 : f32
    %44 = vector.broadcast %cst_37 : f32 to vector<8x128xf32>
    %45 = arith.addf %44, %43 : vector<8x128xf32>
    %46 = arith.divf %44, %45 : vector<8x128xf32>
    %c0_38 = arith.constant 0 : index
    %c0_39 = arith.constant 0 : index
    %47 = vector.load %arg8[%c0_38, %c0_39] : memref<8x128xf32, #tpu.memory_space<vmem>>, vector<8x128xf32>
    %48 = arith.mulf %38, %47 : vector<8x128xf32>
    %49 = arith.mulf %32, %40 : vector<8x128xf32>
    %50 = arith.addf %48, %49 : vector<8x128xf32>
    %c0_40 = arith.constant 0 : index
    %c0_41 = arith.constant 0 : index
    %51 = vector.load %arg8[%c0_40, %c0_41] : memref<8x128xf32, #tpu.memory_space<vmem>>, vector<8x128xf32>
    tpu.vector_store %arg8[%c0_40, %c0_41], %50 {strides = array<i32>} : memref<8x128xf32, #tpu.memory_space<vmem>>, vector<8x128xf32>,
    %52 = math.tanh %50 : vector<8x128xf32>
    %53 = arith.mulf %46, %52 : vector<8x128xf32>
    %c0_42 = arith.constant 0 : index
    %c0_43 = arith.constant 0 : index
    %54 = vector.load %arg7[%c0_42, %c0_43] : memref<8x128xf32, #tpu.memory_space<vmem>>, vector<8x128xf32>
    tpu.vector_store %arg7[%c0_42, %c0_43], %53 {strides = array<i32>} : memref<8x128xf32, #tpu.memory_space<vmem>>, vector<8x128xf32>,
    %c1_i32_44 = arith.constant 1 : i32
    %c7_i32 = arith.constant 7 : i32
    %55 = arith.addi %c1_i32_44, %c7_i32 : i32
    %c1_i32_45 = arith.constant 1 : i32
    scf.for %arg10 = %c1_i32_44 to %55 step %c1_i32_45  : i32 {
      %c0_47 = arith.constant 0 : index
      %c0_48 = arith.constant 0 : index
      %56 = vector.load %arg7[%c0_47, %c0_48] : memref<8x128xf32, #tpu.memory_space<vmem>>, vector<8x128xf32>
      %57 = arith.truncf %56 : vector<8x128xf32> to vector<8x128xbf16>
      %c0_49 = arith.constant 0 : index
      %c0_50 = arith.constant 0 : index
      %58 = vector.load %arg5[%c0_49, %c0_50] : memref<128x128xbf16, #tpu.memory_space<vmem>>, vector<128x128xbf16>
      %cst_51 = arith.constant dense<0.000000e+00> : vector<8x128xf32>
      %59 = tpu.matmul %57, %58, %cst_51 {dimension_numbers = #tpu.dot_dimension_numbers<[1], [0], [0], [1], [0, 0, 1, 1], [], []>} : vector<8x128xbf16>, vector<128x128xbf16>, vector<8x128xf32> -> vector<8x128xf32>
      %60 = arith.index_cast %arg10 : i32 to index
      %c0_52 = arith.constant 0 : index
      %c0_53 = arith.constant 0 : index
      %61 = vector.load %arg6[%60, %c0_52, %c0_53] : memref<8x8x128xf32, #tpu.memory_space<vmem>>, vector<1x8x128xf32>
      %62 = vector.shape_cast %61 : vector<1x8x128xf32> to vector<8x128xf32>
      %63 = vector.shape_cast %59 : vector<8x128xf32> to vector<1x8x128xf32>
      tpu.vector_store %arg6[%60, %c0_52, %c0_53], %63 {strides = array<i32>} : memref<8x8x128xf32, #tpu.memory_space<vmem>>, vector<1x8x128xf32>,
      %64 = arith.index_cast %arg10 : i32 to index
      %c0_54 = arith.constant 0 : index
      %c0_55 = arith.constant 0 : index
      %65 = vector.load %arg1[%64, %c0_54, %c0_55] : memref<8x8x1xi32, #tpu.memory_space<vmem>>, vector<1x8x1xi32>
      %66 = vector.shape_cast %65 : vector<1x8x1xi32> to vector<8x1xi32>
      %67 = tpu.iota {dimensions = array<i32: 1>} : vector<8x128xi32>
      %68 = vector.broadcast %66 : vector<8x1xi32> to vector<8x128xi32>
      %69 = arith.cmpi eq, %67, %68 : vector<8x128xi32>
      %cst_56 = arith.constant 1.000000e+00 : f32
      %cst_57 = arith.constant 0.000000e+00 : f32
      %70 = vector.broadcast %cst_56 : f32 to vector<8x128xf32>
      %71 = vector.broadcast %cst_57 : f32 to vector<8x128xf32>
      %72 = arith.select %69, %70, %71 : vector<8x128xi1>, vector<8x128xf32>
      %73 = arith.truncf %72 : vector<8x128xf32> to vector<8x128xbf16>
      %c0_58 = arith.constant 0 : index
      %c0_59 = arith.constant 0 : index
      %74 = vector.load %arg3[%c0_58, %c0_59] : memref<128x512xbf16, #tpu.memory_space<vmem>>, vector<128x512xbf16>
      %cst_60 = arith.constant dense<0.000000e+00> : vector<8x512xf32>
      %75 = tpu.matmul %73, %74, %cst_60 {dimension_numbers = #tpu.dot_dimension_numbers<[1], [0], [0], [1], [0, 0, 1, 1], [], []>} : vector<8x128xbf16>, vector<128x512xbf16>, vector<8x512xf32> -> vector<8x512xf32>
      %c0_61 = arith.constant 0 : index
      %c0_62 = arith.constant 0 : index
      %76 = vector.load %arg7[%c0_61, %c0_62] : memref<8x128xf32, #tpu.memory_space<vmem>>, vector<8x128xf32>
      %77 = arith.truncf %76 : vector<8x128xf32> to vector<8x128xbf16>
      %c0_63 = arith.constant 0 : index
      %c0_64 = arith.constant 0 : index
      %78 = vector.load %arg2[%c0_63, %c0_64] : memref<1x512xf32, #tpu.memory_space<vmem>>, vector<1x512xf32>
      %c0_65 = arith.constant 0 : index
      %c0_66 = arith.constant 0 : index
      %79 = vector.load %arg4[%c0_65, %c0_66] : memref<128x512xbf16, #tpu.memory_space<vmem>>, vector<128x512xbf16>
      %cst_67 = arith.constant dense<0.000000e+00> : vector<8x512xf32>
      %80 = tpu.matmul %77, %79, %cst_67 {dimension_numbers = #tpu.dot_dimension_numbers<[1], [0], [0], [1], [0, 0, 1, 1], [], []>} : vector<8x128xbf16>, vector<128x512xbf16>, vector<8x512xf32> -> vector<8x512xf32>
      %81 = vector.broadcast %78 : vector<1x512xf32> to vector<8x512xf32>
      %82 = arith.addf %81, %80 : vector<8x512xf32>
      %83 = arith.addf %82, %75 : vector<8x512xf32>
      %c0_68 = arith.constant 0 : index
      %c0_69 = arith.constant 0 : index
      %84 = vector.load %arg9[%c0_68, %c0_69] : memref<8x512xf32, #tpu.memory_space<vmem>>, vector<8x512xf32>
      tpu.vector_store %arg9[%c0_68, %c0_69], %83 {strides = array<i32>} : memref<8x512xf32, #tpu.memory_space<vmem>>, vector<8x512xf32>,
      %c0_70 = arith.constant 0 : index
      %c0_71 = arith.constant 0 : index
      %85 = vector.load %arg9[%c0_70, %c0_71] : memref<8x512xf32, #tpu.memory_space<vmem>>, vector<8x128xf32>
      %86 = arith.negf %85 : vector<8x128xf32>
      %87 = math.exp %86 : vector<8x128xf32>
      %cst_72 = arith.constant 1.000000e+00 : f32
      %88 = vector.broadcast %cst_72 : f32 to vector<8x128xf32>
      %89 = arith.addf %88, %87 : vector<8x128xf32>
      %90 = arith.divf %88, %89 : vector<8x128xf32>
      %c0_73 = arith.constant 0 : index
      %c128_74 = arith.constant 128 : index
      %91 = vector.load %arg9[%c0_73, %c128_74] : memref<8x512xf32, #tpu.memory_space<vmem>>, vector<8x128xf32>
      %92 = arith.negf %91 : vector<8x128xf32>
      %93 = math.exp %92 : vector<8x128xf32>
      %cst_75 = arith.constant 1.000000e+00 : f32
      %94 = vector.broadcast %cst_75 : f32 to vector<8x128xf32>
      %95 = arith.addf %94, %93 : vector<8x128xf32>
      %96 = arith.divf %94, %95 : vector<8x128xf32>
      %c0_76 = arith.constant 0 : index
      %c256_77 = arith.constant 256 : index
      %97 = vector.load %arg9[%c0_76, %c256_77] : memref<8x512xf32, #tpu.memory_space<vmem>>, vector<8x128xf32>
      %98 = math.tanh %97 : vector<8x128xf32>
      %c0_78 = arith.constant 0 : index
      %c384_79 = arith.constant 384 : index
      %99 = vector.load %arg9[%c0_78, %c384_79] : memref<8x512xf32, #tpu.memory_space<vmem>>, vector<8x128xf32>
      %100 = arith.negf %99 : vector<8x128xf32>
      %101 = math.exp %100 : vector<8x128xf32>
      %cst_80 = arith.constant 1.000000e+00 : f32
      %102 = vector.broadcast %cst_80 : f32 to vector<8x128xf32>
      %103 = arith.addf %102, %101 : vector<8x128xf32>
      %104 = arith.divf %102, %103 : vector<8x128xf32>
      %c0_81 = arith.constant 0 : index
      %c0_82 = arith.constant 0 : index
      %105 = vector.load %arg8[%c0_81, %c0_82] : memref<8x128xf32, #tpu.memory_space<vmem>>, vector<8x128xf32>
      %106 = arith.mulf %96, %105 : vector<8x128xf32>
      %107 = arith.mulf %90, %98 : vector<8x128xf32>
      %108 = arith.addf %106, %107 : vector<8x128xf32>
      %c0_83 = arith.constant 0 : index
      %c0_84 = arith.constant 0 : index
      %109 = vector.load %arg8[%c0_83, %c0_84] : memref<8x128xf32, #tpu.memory_space<vmem>>, vector<8x128xf32>
      tpu.vector_store %arg8[%c0_83, %c0_84], %108 {strides = array<i32>} : memref<8x128xf32, #tpu.memory_space<vmem>>, vector<8x128xf32>,
      %110 = math.tanh %108 : vector<8x128xf32>
      %111 = arith.mulf %104, %110 : vector<8x128xf32>
      %c0_85 = arith.constant 0 : index
      %c0_86 = arith.constant 0 : index
      %112 = vector.load %arg7[%c0_85, %c0_86] : memref<8x128xf32, #tpu.memory_space<vmem>>, vector<8x128xf32>
      tpu.vector_store %arg7[%c0_85, %c0_86], %111 {strides = array<i32>} : memref<8x128xf32, #tpu.memory_space<vmem>>, vector<8x128xf32>,
    }
    %c7_i32_46 = arith.constant 7 : i32
    return
  }
}

</mosaic_0001>

<bundles_post_ra>
// kernel: tpu_custom_call.1
= control target key start
LH: loop header
LB: loop body
LE: loop exit
PB: predicated region body
PF: predicated region fallthrough
CT: control target
= control target key end

     0   :  { %11 = vsyncpa [#allocation6], 0  ;;  %s3688_s0 = inlined_call_operand.vmem [shape: s32[8,8,1], index: 0, kind: input, shape index: {}]   ;;  %s3689_s1 = inlined_call_operand.vmem [shape: s32[8,8,1], index: 1, kind: input, shape index: {}]   ;;  %s3690_s2 = inlined_call_operand.vmem [shape: f32[1,512], index: 2, kind: input, shape index: {}]   ;;  %s3691_s3 = inlined_call_operand.hbm [shape: bf16[128,512], index: 3, kind: input, shape index: {}]   ;;  %s3692_s4 = inlined_call_operand.hbm [shape: bf16[128,512], index: 4, kind: input, shape index: {}]   ;;  %s3693_s5 = inlined_call_operand.vmem [shape: bf16[128,128], index: 5, kind: input, shape index: {}]   ;;  %s3694_s6 = inlined_call_operand.hbm [shape: f32[8,8,128], index: 6, kind: output, shape index: {}]  }
   0x1   :  { %12 = vsyncpa [#allocation9], 0 }
   0x2   :  { %13 = vsyncpa [#allocation7], 0  ;;  %s3444_s21 = smov [#allocation5]   ;;  %s3348_s25 = scalar_lea.hbm %s3691_s3, 4096 }
   0x3   :  { %s25_s22 = sshll.u32 %s3444_s21, 4  ;;  %p3349_p0 = scmp.ne.s32.totalorder %s3691_s3, %s3348_s25  ;;  %s26_s22 = int_to_ptr.vmem [resolvable:$true] %s25_s22 }
   0x4   :  { %p3352_p1 = scmp.lt.u32.totalorder %s3348_s25, %s3691_s3 }
   0x6   :  { %p3354_p2 = pnand %p3352_p1, %p3349_p0 }
   0x8   :  { %3357 = shalt.err (!%p3354_p2)
}
   0x9   :  { %s3358_s30 = scalar_lea.vmem %s26_s22, 4096  ;;  %p3363_p4 = scmp.lt.s32.totalorder %s26_s22, %s26_s22 }
   0xa   :  { %p3359_p3 = scmp.ne.s32.totalorder %s26_s22, %s3358_s30  ;;  %p3364_p5 = scmp.lt.s32.totalorder %s3358_s30, %s3358_s30 }
   0xc   :  { %p3365_p6 = por %p3364_p5, %p3363_p4 }
   0xe   :  { %p3366_p7 = pnand %p3365_p6, %p3359_p3 }
  0x10   :  { %3369 = shalt.err (!%p3366_p7)
}
  0x11   :  { %s3445_s7 = smov 256   ;;  %s3446_s8 = smov 16  }
  0x12   :  { %31 = dma.hbm_to_vmem [thread:$0]  %s3691_s3, 4096, %s26_s22, [#allocation6], %s3445_s7, %s3445_s7, %s3446_s8  }
  0x13   :  { %s3447_s11 = smov [#allocation8]   ;;  %s3370_s15 = scalar_lea.hbm %s3692_s4, 4096 }
  0x14   :  { %s37_s12 = sshll.u32 %s3447_s11, 4  ;;  %p3371_p8 = scmp.ne.s32.totalorder %s3692_s4, %s3370_s15  ;;  %s38_s12 = int_to_ptr.vmem [resolvable:$true] %s37_s12 }
  0x15   :  { %p3374_p9 = scmp.lt.u32.totalorder %s3370_s15, %s3692_s4 }
  0x17   :  { %p3376_p10 = pnand %p3374_p9, %p3371_p8 }
  0x19   :  { %3379 = shalt.err (!%p3376_p10)
}
  0x1a   :  { %s3380_s20 = scalar_lea.vmem %s38_s12, 4096  ;;  %p3385_p12 = scmp.lt.s32.totalorder %s38_s12, %s38_s12 }
  0x1b   :  { %p3381_p11 = scmp.ne.s32.totalorder %s38_s12, %s3380_s20  ;;  %p3386_p13 = scmp.lt.s32.totalorder %s3380_s20, %s3380_s20 }
  0x1d   :  { %p3387_p0 = por %p3386_p13, %p3385_p12 }
  0x1f   :  { %p3388_p1 = pnand %p3387_p0, %p3381_p11 }
  0x21   :  { %3391 = shalt.err (!%p3388_p1)
}
  0x22   :  { %43 = dma.hbm_to_vmem [thread:$0]  %s3692_s4, 4096, %s38_s12, [#allocation9], %s3445_s7, %s3445_s7, %s3446_s8  }
  0x23   :  { %3426 = dma.done.wait [#allocation6], 4096  }
  0x24   :  { %3427 = vsyncadd [#allocation6], 4294963200 }
  0x25   :  { %3428 = dma.done.wait [#allocation9], 4096  }
  0x26   :  { %3429 = vsyncadd [#allocation9], 4294963200  ;;  %v3448_v0 = vmov 0.0   ;;  %s3522_s22 = smov 0  }
  0x27   :  { %53 = vst [vmem:[#allocation2] sm:$0xff] %v3448_v0  ;;  %54 = vst [vmem:[#allocation3] sm:$0xff] %v3448_v0 }
  0x28 LB: > { %v2931_v1 = vld [vmem:[#allocation5 + $0x4] ss:$16 sps:$4 sm:$0xff]   ;;  %v3449_v2 = vmov 0   ;;  %v2933_v3 = vld [vmem:[#allocation5 + $0xc] ss:$16 sps:$4 sm:$0xff]   ;;  %s2533_s4 = sshll.u32 %s3434_s22, 3  ;;  %v64_v37 = vlaneseq  ;;  %s3434_s22 = sphi %s3522_s22, %s60_s22  }
  0x29   : > { %2930 = vset.pattern.permute.xlu0 %v3449_v2  ;;  %296 = vmatprep.mubr.bf16.mxu0 %v3449_v2  ;;  %v2935_v4 = vld [vmem:[#allocation5] ss:$16 sps:$4 sm:$0xff]   ;;  %v2936_v5 = vld [vmem:[#allocation5 + $0x8] ss:$16 sps:$4 sm:$0xff]   ;;  %s62_s25 = scalar_lea.vmem %s3688_s0, %s2533_s4  ;;  %v2937_v6 = vld [vmem:[#allocation5 + $0x24] ss:$16 sps:$4 sm:$0xff]  }
  0x2a   : > { %264 = vmatprep.subr.bf16.mxu0 %v2931_v1  ;;  %337 = vmatprep.mubr.bf16.mxu1 %v3449_v2  ;;  %v63_v7 = vld [vmem:[%s62_s25] sm:$0xff]  ;;  %v2939_v8 = vld [vmem:[#allocation5 + $0x2c] ss:$16 sps:$4 sm:$0xff]   ;;  %v2942_v10 = vld [vmem:[#allocation5 + $0x28] ss:$16 sps:$4 sm:$0xff]   ;;  %v3535_v38 = vand.u32 127, %v64_v37 }
  0x2b   : > { %305 = vmatprep.subr.bf16.mxu1 %v2933_v3  ;;  %265 = vmatpush1.bf16.msra.mxu0 %v2935_v4  ;;  %v2941_v9 = vld [vmem:[#allocation5 + $0x20] ss:$16 sps:$4 sm:$0xff]   ;;  %v2943_v11 = vld [vmem:[#allocation5 + $0x44] ss:$16 sps:$4 sm:$0xff]   ;;  %v2945_v12 = vld [vmem:[#allocation5 + $0x4c] ss:$16 sps:$4 sm:$0xff]  }
  0x2c   : > { %306 = vmatpush1.bf16.msra.mxu1 %v2936_v5  ;;  %67 = vperm.xlu0 %2930, %v63_v7   ;;  %v2947_v13 = vld [vmem:[#allocation5 + $0x40] ss:$16 sps:$4 sm:$0xff]   ;;  %v2948_v14 = vld [vmem:[#allocation5 + $0x48] ss:$16 sps:$4 sm:$0xff]   ;;  %v2949_v15 = vld [vmem:[#allocation5 + $0x64] ss:$16 sps:$4 sm:$0xff]  }
  0x2d   : > { %266 = vmatprep.subr.bf16.mxu0 %v2937_v6  ;;  %307 = vmatprep.subr.bf16.mxu1 %v2939_v8  ;;  %v2951_v16 = vld [vmem:[#allocation5 + $0x6c] ss:$16 sps:$4 sm:$0xff]   ;;  %v2953_v17 = vld [vmem:[#allocation5 + $0x60] ss:$16 sps:$4 sm:$0xff]   ;;  %v2954_v18 = vld [vmem:[#allocation5 + $0x68] ss:$16 sps:$4 sm:$0xff]  }
  0x2e   : > { %v2955_v19 = vld [vmem:[#allocation5 + $0x84] ss:$16 sps:$4 sm:$0xff]   ;;  %v2957_v20 = vld [vmem:[#allocation5 + $0x8c] ss:$16 sps:$4 sm:$0xff]   ;;  %v2959_v21 = vld [vmem:[#allocation5 + $0x80] ss:$16 sps:$4 sm:$0xff]  }
  0x2f   : > { %267 = vmatpush1.bf16.msra.mxu0 %v2941_v9  ;;  %v2960_v22 = vld [vmem:[#allocation5 + $0x88] ss:$16 sps:$4 sm:$0xff]   ;;  %v2961_v23 = vld [vmem:[#allocation5 + $0xa4] ss:$16 sps:$4 sm:$0xff]   ;;  %v2963_v24 = vld [vmem:[#allocation5 + $0xac] ss:$16 sps:$4 sm:$0xff]  }
  0x30   : > { %308 = vmatpush1.bf16.msra.mxu1 %v2942_v10  ;;  %268 = vmatprep.subr.bf16.mxu0 %v2943_v11  ;;  %v2965_v25 = vld [vmem:[#allocation5 + $0xa0] ss:$16 sps:$4 sm:$0xff]   ;;  %v2966_v26 = vld [vmem:[#allocation5 + $0xa8] ss:$16 sps:$4 sm:$0xff]   ;;  %v2967_v27 = vld [vmem:[#allocation5 + $0xc4] ss:$16 sps:$4 sm:$0xff]  }
  0x31   : > { %309 = vmatprep.subr.bf16.mxu1 %v2945_v12  ;;  %v2969_v28 = vld [vmem:[#allocation5 + $0xcc] ss:$16 sps:$4 sm:$0xff]   ;;  %v2971_v29 = vld [vmem:[#allocation5 + $0xc0] ss:$16 sps:$4 sm:$0xff]   ;;  %v2972_v30 = vld [vmem:[#allocation5 + $0xc8] ss:$16 sps:$4 sm:$0xff]  }
  0x32   : > { %v2973_v31 = vld [vmem:[#allocation5 + $0xe4] ss:$16 sps:$4 sm:$0xff]   ;;  %v2975_v32 = vld [vmem:[#allocation5 + $0xec] ss:$16 sps:$4 sm:$0xff]   ;;  %v2977_v33 = vld [vmem:[#allocation5 + $0xe0] ss:$16 sps:$4 sm:$0xff]  }
  0x33   : > { %269 = vmatpush1.bf16.msra.mxu0 %v2947_v13  ;;  %v2978_v34 = vld [vmem:[#allocation5 + $0xe8] ss:$16 sps:$4 sm:$0xff]   ;;  %v2981_v35 = vld [vmem:[#allocation8 + $0x4] ss:$16 sps:$4 sm:$0xff]   ;;  %v2984_v36 = vld [vmem:[#allocation8 + $0xc] ss:$16 sps:$4 sm:$0xff]  }
  0x34   : > { %310 = vmatpush1.bf16.msra.mxu1 %v2948_v14  ;;  %270 = vmatprep.subr.bf16.mxu0 %v2949_v15  ;;  %v2979_v40 = vld [vmem:[#allocation8] ss:$16 sps:$4 sm:$0xff]   ;;  %v2982_v41 = vld [vmem:[#allocation8 + $0x8] ss:$16 sps:$4 sm:$0xff]   ;;  %v2987_v42 = vld [vmem:[#allocation8 + $0x24] ss:$16 sps:$4 sm:$0xff]  }
  0x35   : > { %311 = vmatprep.subr.bf16.mxu1 %v2951_v16  ;;  %v2990_v43 = vld [vmem:[#allocation8 + $0x2c] ss:$16 sps:$4 sm:$0xff]   ;;  %v3450_v44 = vmov 1.0|1.0   ;;  %v2985_v45 = vld [vmem:[#allocation8 + $0x20] ss:$16 sps:$4 sm:$0xff]  }
  0x36   : > { %v2988_v46 = vld [vmem:[#allocation8 + $0x28] ss:$16 sps:$4 sm:$0xff]   ;;  %v2993_v47 = vld [vmem:[#allocation8 + $0x44] ss:$16 sps:$4 sm:$0xff]   ;;  %v2996_v48 = vld [vmem:[#allocation8 + $0x4c] ss:$16 sps:$4 sm:$0xff]  }
  0x37   : > { %271 = vmatpush1.bf16.msra.mxu0 %v2953_v17  ;;  %v2991_v49 = vld [vmem:[#allocation8 + $0x40] ss:$16 sps:$4 sm:$0xff]   ;;  %v2994_v50 = vld [vmem:[#allocation8 + $0x48] ss:$16 sps:$4 sm:$0xff]   ;;  %v2999_v51 = vld [vmem:[#allocation8 + $0x64] ss:$16 sps:$4 sm:$0xff]  }
  0x38   : > { %312 = vmatpush1.bf16.msra.mxu1 %v2954_v18  ;;  %272 = vmatprep.subr.bf16.mxu0 %v2955_v19  ;;  %v3002_v52 = vld [vmem:[#allocation8 + $0x6c] ss:$16 sps:$4 sm:$0xff]   ;;  %v2997_v53 = vld [vmem:[#allocation8 + $0x60] ss:$16 sps:$4 sm:$0xff]   ;;  %v3000_v54 = vld [vmem:[#allocation8 + $0x68] ss:$16 sps:$4 sm:$0xff]  }
  0x39   : > { %313 = vmatprep.subr.bf16.mxu1 %v2957_v20  ;;  %v3005_v55 = vld [vmem:[#allocation8 + $0x84] ss:$16 sps:$4 sm:$0xff]   ;;  %v3008_v56 = vld [vmem:[#allocation8 + $0x8c] ss:$16 sps:$4 sm:$0xff]   ;;  %v3003_v57 = vld [vmem:[#allocation8 + $0x80] ss:$16 sps:$4 sm:$0xff]  }
  0x3a   : > { %v3006_v58 = vld [vmem:[#allocation8 + $0x88] ss:$16 sps:$4 sm:$0xff]   ;;  %v3011_v59 = vld [vmem:[#allocation8 + $0xa4] ss:$16 sps:$4 sm:$0xff]   ;;  %v3014_v60 = vld [vmem:[#allocation8 + $0xac] ss:$16 sps:$4 sm:$0xff]  }
  0x3b   : > { %273 = vmatpush1.bf16.msra.mxu0 %v2959_v21  ;;  %v3009_v61 = vld [vmem:[#allocation8 + $0xa0] ss:$16 sps:$4 sm:$0xff]   ;;  %v3012_v62 = vld [vmem:[#allocation8 + $0xa8] ss:$16 sps:$4 sm:$0xff]   ;;  %v3017_v63 = vld [vmem:[#allocation8 + $0xc4] ss:$16 sps:$4 sm:$0xff]  }
  0x3c   : > { %314 = vmatpush1.bf16.msra.mxu1 %v2960_v22  ;;  %274 = vmatprep.subr.bf16.mxu0 %v2961_v23  ;;  %v3020_v1 = vld [vmem:[#allocation8 + $0xcc] ss:$16 sps:$4 sm:$0xff]   ;;  %v3018_v3 = vld [vmem:[#allocation8 + $0xc8] ss:$16 sps:$4 sm:$0xff]   ;;  %v3023_v4 = vld [vmem:[#allocation8 + $0xe4] ss:$16 sps:$4 sm:$0xff]  }
  0x3d   : > { %315 = vmatprep.subr.bf16.mxu1 %v2963_v24  ;;  %v3026_v5 = vld [vmem:[#allocation8 + $0xec] ss:$16 sps:$4 sm:$0xff]   ;;  %v3021_v6 = vld [vmem:[#allocation8 + $0xe0] ss:$16 sps:$4 sm:$0xff]   ;;  %v3024_v7 = vld [vmem:[#allocation8 + $0xe8] ss:$16 sps:$4 sm:$0xff]  }
  0x3e   : > { %v346_v8 = vld [vmem:[#allocation2] sm:$0xff]  ;;  %v625_v10 = vshrl.u32 %v64_v37, 7  ;;  %s60_s22 = sadd.s32 1, %s3434_s22  }
  0x3f   : > { %275 = vmatpush1.bf16.msra.mxu0 %v2965_v25  ;;  %v347_v9 = vpack.c.bf16 %v346_v8, %v346_v8  ;;  %v348_v13 = vld [vmem:[%s3690_s2] sm:$0xf]  ;;  %p57_p2 = scmp.ge.s32.totalorder %s60_s22, 8  }
  0x40   : > { %316 = vmatpush1.bf16.msra.mxu1 %v2966_v26  ;;  %276 = vmatprep.subr.bf16.mxu0 %v2967_v27  ;;  %v3541_v11 = vsub.s32 0, %v625_v10  ;;  %v3543_v12 = vsub.s32 2, %v625_v10  ;;  %v3548_v14 = vsub.s32 1, %v625_v10  ;;  %v3550_v15 = vsub.s32 3, %v625_v10  ;;  %s3592_s19 = smov (%p57_p2), 0  }
  0x41   : > { %317 = vmatprep.subr.bf16.mxu1 %v2969_v28  ;;  %vm3451_vm2 = vmmov (%p57_p2), 0  }
  0x42   : > { %v627_v16 = vrot.slane %v348_v13, %v3541_v11  ;;  %v635_v17 = vrot.slane %v348_v13, %v3543_v12  ;;  %v631_v18 = vrot.slane %v348_v13, %v3548_v14  ;;  %v639_v19 = vrot.slane %v348_v13, %v3550_v15 }
  0x43   : > { %277 = vmatpush1.bf16.msra.mxu0 %v2971_v29 }
  0x44   : > { %318 = vmatpush1.bf16.msra.mxu1 %v2972_v30  ;;  %278 = vmatprep.subr.bf16.mxu0 %v2973_v31 }
  0x45   : > { %319 = vmatprep.subr.bf16.mxu1 %v2975_v32 }
  0x47   : > { %279 = vmatpush1.bf16.msra.mxu0 %v2977_v33 }
  0x48   : > { %320 = vmatpush1.bf16.msra.mxu1 %v2978_v34  ;;  %541 = vmatprep.subr.bf16.mxu0 %v2981_v35 }
  0x49   : > { %582 = vmatprep.subr.bf16.mxu1 %v2984_v36 }
  0xab   : > { %v68_v39 = vpop.permute.xlu0 %67 }
  0xac   : > { %vm69_vm0 = vcmp.eq.s32.totalorder %v3535_v38, %v68_v39 }
  0xad   : > { %vm2566_vm1 = vmpackc.low %vm69_vm0, %vm69_vm0 }
  0xae   : > { %2567 = vmatmul.mubr.msk.bf16.vlgmr.msra.gmra.mrb[0].mxu0 %vm2566_vm1, %v3450_v44  ;;  %2569 = vmatmul.mubr.msk.bf16.vlgmr.msra.gmra.mrb[0].mxu1 %vm2566_vm1, %v3450_v44 }
  0xaf   : > { %542 = vmatpush1.bf16.msra.mxu0 %v2979_v40  ;;  %583 = vmatpush1.bf16.msra.mxu1 %v2982_v41 }
  0xb0   : > { %543 = vmatprep.subr.bf16.mxu0 %v2987_v42  ;;  %584 = vmatprep.subr.bf16.mxu1 %v2990_v43  ;;  %v679_v42 = vld [vmem:[#allocation3] sm:$0xff] }
  0xb1   : > { %573 = vmatprep.mubr.bf16.mxu0 %v3449_v2  ;;  %614 = vmatprep.mubr.bf16.mxu1 %v3449_v2  ;;  %v3015_v2 = vld [vmem:[#allocation8 + $0xc0] ss:$16 sps:$4 sm:$0xff]  }
  0xb3   : > { %544 = vmatpush1.bf16.msra.mxu0 %v2985_v45  ;;  %585 = vmatpush1.bf16.msra.mxu1 %v2988_v46 }
  0xb4   : > { %545 = vmatprep.subr.bf16.mxu0 %v2993_v47  ;;  %586 = vmatprep.subr.bf16.mxu1 %v2996_v48 }
  0xb7   : > { %546 = vmatpush1.bf16.msra.mxu0 %v2991_v49  ;;  %587 = vmatpush1.bf16.msra.mxu1 %v2994_v50 }
  0xb8   : > { %547 = vmatprep.subr.bf16.mxu0 %v2999_v51  ;;  %588 = vmatprep.subr.bf16.mxu1 %v3002_v52  ;;  %v3043_v52 = vld [vmem:[%s3693_s5] sm:$0xff] (%p57_p2)  }
  0xbb   : > { %548 = vmatpush1.bf16.msra.mxu0 %v2997_v53  ;;  %589 = vmatpush1.bf16.msra.mxu1 %v3000_v54  ;;  %v3044_v53 = vld [vmem:[%s3693_s5 + $0x8] sm:$0xff] (%p57_p2)   ;;  %v3045_v54 = vld [vmem:[%s3693_s5 + $0x10] sm:$0xff] (%p57_p2)  }
  0xbc   : > { %549 = vmatprep.subr.bf16.mxu0 %v3005_v55  ;;  %590 = vmatprep.subr.bf16.mxu1 %v3008_v56  ;;  %v3046_v55 = vld [vmem:[%s3693_s5 + $0x18] sm:$0xff] (%p57_p2)   ;;  %v3047_v56 = vld [vmem:[%s3693_s5 + $0x20] sm:$0xff] (%p57_p2)  }
  0xbf   : > { %550 = vmatpush1.bf16.msra.mxu0 %v3003_v57  ;;  %591 = vmatpush1.bf16.msra.mxu1 %v3006_v58  ;;  %v3048_v57 = vld [vmem:[%s3693_s5 + $0x28] sm:$0xff] (%p57_p2)   ;;  %v3049_v58 = vld [vmem:[%s3693_s5 + $0x30] sm:$0xff] (%p57_p2)  }
  0xc0   : > { %551 = vmatprep.subr.bf16.mxu0 %v3011_v59  ;;  %592 = vmatprep.subr.bf16.mxu1 %v3014_v60  ;;  %v3050_v59 = vld [vmem:[%s3693_s5 + $0x38] sm:$0xff] (%p57_p2)  }
  0xc3   : > { %552 = vmatpush1.bf16.msra.mxu0 %v3009_v61  ;;  %593 = vmatpush1.bf16.msra.mxu1 %v3012_v62 }
  0xc4   : > { %553 = vmatprep.subr.bf16.mxu0 %v3017_v63  ;;  %594 = vmatprep.subr.bf16.mxu1 %v3020_v1 }
  0xc7   : > { %554 = vmatpush1.bf16.msra.mxu0 %v3015_v2  ;;  %595 = vmatpush1.bf16.msra.mxu1 %v3018_v3 }
  0xc8   : > { %555 = vmatprep.subr.bf16.mxu0 %v3023_v4  ;;  %596 = vmatprep.subr.bf16.mxu1 %v3026_v5 }
  0xcb   : > { %556 = vmatpush1.bf16.msra.mxu0 %v3021_v6  ;;  %597 = vmatpush1.bf16.msra.mxu1 %v3024_v7 }
  0xcc   :  { %2813 = vmatprep.subr.bf16.mxu0 (%p57_p2), %v3448_v0 }
  0xce   : > { %574 = vmatmul.mubr.bf16.vlgmr.msra.gmra.mrb[0].mxu0 %v347_v9  ;;  %615 = vmatmul.mubr.bf16.vlgmr.msra.gmra.mrb[0].mxu1 %v347_v9 }
  0xcf   :  { %2829 = vmatprep.mubr.msk.bf16.mxu0 (%p57_p2), %vm3451_vm2, %v3448_v0  ;;  %2814 = vmatpush3.bf16.msra.mxu0 (%p57_p2), %v3043_v52 }
  0xd0   :  { %2815 = vmatprep.subr.bf16.mxu0 (%p57_p2), %v3448_v0 }
  0xd3   :  { %2816 = vmatpush3.bf16.msra.mxu0 (%p57_p2), %v3044_v53 }
  0xd4   :  { %2817 = vmatprep.subr.bf16.mxu0 (%p57_p2), %v3448_v0 }
  0xd7   :  { %2818 = vmatpush3.bf16.msra.mxu0 (%p57_p2), %v3045_v54 }
  0xd8   :  { %2819 = vmatprep.subr.bf16.mxu0 (%p57_p2), %v3448_v0 }
  0xdb   :  { %2820 = vmatpush3.bf16.msra.mxu0 (%p57_p2), %v3046_v55 }
  0xdc   :  { %2821 = vmatprep.subr.bf16.mxu0 (%p57_p2), %v3448_v0 }
  0xdf   :  { %2822 = vmatpush3.bf16.msra.mxu0 (%p57_p2), %v3047_v56 }
  0xe0   :  { %2823 = vmatprep.subr.bf16.mxu0 (%p57_p2), %v3448_v0 }
  0xe3   :  { %2824 = vmatpush3.bf16.msra.mxu0 (%p57_p2), %v3048_v57 }
  0xe4   :  { %2825 = vmatprep.subr.bf16.mxu0 (%p57_p2), %v3448_v0 }
  0xe7   :  { %2826 = vmatpush3.bf16.msra.mxu0 (%p57_p2), %v3049_v58 }
  0xe8   :  { %2827 = vmatprep.subr.bf16.mxu0 (%p57_p2), %v3448_v0 }
  0xeb   :  { %2828 = vmatpush3.bf16.msra.mxu0 (%p57_p2), %v3050_v59 }
 0x1a1   : > { %v575_v20 = vpop.f32.mrb[0].mxu0  ;;  %v616_v21 = vpop.f32.mrb[0].mxu1 }
 0x1a2   : > { %v644_v22 = vadd.f32 %v627_v16, %v575_v20  ;;  %v646_v23 = vadd.f32 %v635_v17, %v616_v21  ;;  %v577_v24 = vpop.f32.mrb[1].mxu0  ;;  %v618_v25 = vpop.f32.mrb[1].mxu1 }
 0x1a3   : > { %v645_v26 = vadd.f32 %v631_v18, %v577_v24  ;;  %v647_v27 = vadd.f32 %v639_v19, %v618_v25  ;;  %v579_v28 = vpop.f32.mrb[2].mxu0  ;;  %v620_v29 = vpop.f32.mrb[2].mxu1 }
 0x1a4   : > { %v2602_v30 = vmul.f32 -1.442695, %v644_v22  ;;  %v580_v31 = vpop.f32.mrb[3].mxu0  ;;  %v621_v32 = vpop.f32.mrb[3].mxu1 }
 0x1a5   : > { %v2603_v33 = vmul.f32 -1.442695, %v645_v26  ;;  %v2604_v34 = vmul.f32 -1.442695, %v647_v27 }
 0x1a6   : > { %3027 = vpow2.f32 %v2602_v30 }
 0x1a7   : > { %3029 = vpow2.f32 %v2603_v33 }
 0x1a8   : > { %3031 = vpow2.f32 %v2604_v34 }
 0x1a9   : > { %3033 = vtanh.f32 %v646_v23 }
 0x1b0   : > { %v3028_v35 = vpop.eup %3027 }
 0x1b1   : > { %v3030_v36 = vpop.eup %3029  ;;  %v660_v37 = vadd.f32 1.0, %v3028_v35 }
 0x1b2   : > { %v667_v39 = vadd.f32 1.0, %v3030_v36  ;;  %v3032_v40 = vpop.eup %3031 }
 0x1b3   : > { %3035 = vrcp.f32 %v660_v37  ;;  %v3034_v41 = vpop.eup %3033  ;;  %v676_v46 = vadd.f32 1.0, %v3032_v40 }
 0x1b4   : > { %3037 = vrcp.f32 %v667_v39 }
 0x1b5   : > { %3039 = vrcp.f32 %v676_v46 }
 0x1bd   : > { %v3036_v43 = vpop.eup %3035 }
 0x1be   : > { %v3038_v44 = vpop.eup %3037  ;;  %v681_v45 = vmul.f32 %v3036_v43, %v3034_v41 }
 0x1bf   : > { %v680_v47 = vmul.f32 %v3038_v44, %v679_v42  ;;  %v3040_v49 = vpop.eup %3039 }
 0x1c1   : > { %v682_v48 = vadd.f32 %v681_v45, %v680_v47 }
 0x1c3   : > { %683 = vst [vmem:[#allocation3] sm:$0xff] %v682_v48  ;;  %3041 = vtanh.f32 %v682_v48 }
 0x1ca   :  { %59 = sbr.rel (!%p57_p2) target bundleno = 40 (0x28), region = 76 }
 0x1cd   : > { %v3042_v50 = vpop.eup %3041 }
 0x1ce   : > { %v685_v51 = vmul.f32 %v3042_v50, %v3040_v49 }
 0x1d0   : > { %686 = vst [vmem:[#allocation2] sm:$0xff] %v685_v51 }
 0x1d7   :  { %v687_v60 = vld [vmem:[#allocation2] sm:$0xff] }
 0x1d8   :  { %v688_v61 = vpack.c.bf16 %v687_v60, %v687_v60 }
 0x1da   :  { %2830 = vmatmul.mubr.bf16.vlgmr.msra.gmra.mrb[0].mxu0 %v688_v61 }
 0x2ad   :  { %v787_v62 = vpop.f32.mrb[0].mxu0 }
 0x2ae   :  { %793 = vst [vmem:[#allocation10] sm:$0xff] %v787_v62  ;;  %v2831_v63 = vpop.f32.mrb[1].mxu0 }
 0x2af   :  { %v790_v1 = vpop.f32.mrb[2].mxu0 }
 0x2b0   :  { %v2832_v2 = vpop.f32.mrb[3].mxu0 }
 0x2b1 LB: > { %v3051_v3 = vld [vmem:[#allocation8 + $0x4] ss:$16 sps:$4 sm:$0xff]   ;;  %v3053_v4 = vld [vmem:[#allocation8] ss:$16 sps:$4 sm:$0xff]   ;;  %v3452_v5 = vmov 0   ;;  %s799_s19 = sadd.s32 1, %s3438_s19   ;;  %s3438_s19 = sphi %s3592_s19, %s799_s19  }
 0x2b2   : > { %1027 = vmatprep.mubr.bf16.mxu0 %v3452_v5  ;;  %1068 = vmatprep.mubr.bf16.mxu1 %v3452_v5  ;;  %v3054_v0 = vld [vmem:[#allocation8 + $0x24] ss:$16 sps:$4 sm:$0xff]   ;;  %v3056_v6 = vld [vmem:[#allocation8 + $0x20] ss:$16 sps:$4 sm:$0xff]   ;;  %v3062_v8 = vld [vmem:[#allocation8 + $0xc] ss:$16 sps:$4 sm:$0xff]  }
 0x2b3   : > { %995 = vmatprep.subr.bf16.mxu0 %v3051_v3  ;;  %v3057_v7 = vld [vmem:[#allocation8 + $0x44] ss:$16 sps:$4 sm:$0xff]   ;;  %v3065_v9 = vld [vmem:[#allocation8 + $0x8] ss:$16 sps:$4 sm:$0xff]   ;;  %v3059_v10 = vld [vmem:[#allocation8 + $0x40] ss:$16 sps:$4 sm:$0xff]   ;;  %1036 = vmatprep.subr.bf16.mxu1 %v3062_v8 }
 0x2b4   : > { %996 = vmatpush1.bf16.msra.mxu0 %v3053_v4  ;;  %v3060_v13 = vld [vmem:[#allocation8 + $0x64] ss:$16 sps:$4 sm:$0xff]   ;;  %1037 = vmatpush1.bf16.msra.mxu1 %v3065_v9  ;;  %v3068_v16 = vld [vmem:[#allocation8 + $0x2c] ss:$16 sps:$4 sm:$0xff]   ;;  %v3071_v17 = vld [vmem:[#allocation8 + $0x28] ss:$16 sps:$4 sm:$0xff]  }
 0x2b5   : > { %997 = vmatprep.subr.bf16.mxu0 %v3054_v0  ;;  %1038 = vmatprep.subr.bf16.mxu1 %v3068_v16  ;;  %v3064_v18 = vld [vmem:[#allocation8 + $0x60] ss:$16 sps:$4 sm:$0xff]   ;;  %v3066_v19 = vld [vmem:[#allocation8 + $0x84] ss:$16 sps:$4 sm:$0xff]   ;;  %v3074_v20 = vld [vmem:[#allocation8 + $0x4c] ss:$16 sps:$4 sm:$0xff]  }
 0x2b6   : > { %v3077_v21 = vld [vmem:[#allocation8 + $0x48] ss:$16 sps:$4 sm:$0xff]   ;;  %v3080_v22 = vld [vmem:[#allocation8 + $0x6c] ss:$16 sps:$4 sm:$0xff]   ;;  %v3070_v23 = vld [vmem:[#allocation8 + $0x80] ss:$16 sps:$4 sm:$0xff]  }
 0x2b7   : > { %v3072_v24 = vld [vmem:[#allocation8 + $0xa4] ss:$16 sps:$4 sm:$0xff]   ;;  %v3083_v25 = vld [vmem:[#allocation8 + $0x68] ss:$16 sps:$4 sm:$0xff]   ;;  %v3086_v26 = vld [vmem:[#allocation8 + $0x8c] ss:$16 sps:$4 sm:$0xff]  }
 0x2b8   : > { %998 = vmatpush1.bf16.msra.mxu0 %v3056_v6  ;;  %1039 = vmatpush1.bf16.msra.mxu1 %v3071_v17  ;;  %v3076_v27 = vld [vmem:[#allocation8 + $0xa0] ss:$16 sps:$4 sm:$0xff]   ;;  %v3078_v28 = vld [vmem:[#allocation8 + $0xc4] ss:$16 sps:$4 sm:$0xff]   ;;  %v3089_v29 = vld [vmem:[#allocation8 + $0x88] ss:$16 sps:$4 sm:$0xff]  }
 0x2b9   : > { %999 = vmatprep.subr.bf16.mxu0 %v3057_v7  ;;  %1040 = vmatprep.subr.bf16.mxu1 %v3074_v20  ;;  %v3090_v30 = vld [vmem:[#allocation8 + $0xac] ss:$16 sps:$4 sm:$0xff]   ;;  %v3082_v31 = vld [vmem:[#allocation8 + $0xc0] ss:$16 sps:$4 sm:$0xff]   ;;  %v3084_v32 = vld [vmem:[#allocation8 + $0xe4] ss:$16 sps:$4 sm:$0xff]  }
 0x2ba   : > { %v3092_v33 = vld [vmem:[#allocation8 + $0xa8] ss:$16 sps:$4 sm:$0xff]   ;;  %v3093_v34 = vld [vmem:[#allocation8 + $0xcc] ss:$16 sps:$4 sm:$0xff]   ;;  %v3088_v35 = vld [vmem:[#allocation8 + $0xe0] ss:$16 sps:$4 sm:$0xff]  }
 0x2bb   : > { %v800_v36 = vld [vmem:[#allocation2] sm:$0xff]  ;;  %v3095_v37 = vld [vmem:[#allocation8 + $0xc8] ss:$16 sps:$4 sm:$0xff]   ;;  %v3096_v39 = vld [vmem:[#allocation8 + $0xec] ss:$16 sps:$4 sm:$0xff]   ;;  %p796_p3 = scmp.ge.s32.totalorder %s799_s19, 15  }
 0x2bc   : > { %1000 = vmatpush1.bf16.msra.mxu0 %v3059_v10  ;;  %1041 = vmatpush1.bf16.msra.mxu1 %v3077_v21  ;;  %v801_v40 = vpack.c.bf16 %v800_v36, %v800_v36  ;;  %v3098_v41 = vld [vmem:[#allocation8 + $0xe8] ss:$16 sps:$4 sm:$0xff]   ;;  %v802_v42 = vld [vmem:[%s3690_s2] sm:$0xf]  ;;  %v3453_v20 = vmov (%p796_p3), 0   ;;  %s3618_s4 = smov (%p796_p3), 1  }
 0x2bd   : > { %1001 = vmatprep.subr.bf16.mxu0 %v3060_v13  ;;  %1042 = vmatprep.subr.bf16.mxu1 %v3080_v22  ;;  %v1081_v43 = vrot.slane %v802_v42, %v3541_v11  ;;  %v1085_v44 = vrot.slane %v802_v42, %v3548_v14  ;;  %v1089_v50 = vrot.slane %v802_v42, %v3543_v12  ;;  %v1129_v5 = vld [vmem:[#allocation3] sm:$0xff]  ;;  %v3119_v21 = vld [vmem:[#allocation5] ss:$16 sps:$4 sm:$0xff] (%p796_p3)  }
 0x2be   : > { %v1093_v53 = vrot.slane %v802_v42, %v3550_v15  ;;  %v3120_v22 = vld [vmem:[#allocation5 + $0x8] ss:$16 sps:$4 sm:$0xff] (%p796_p3)   ;;  %v3141_v36 = vld [vmem:[#allocation5 + $0x8c] ss:$16 sps:$4 sm:$0xff] (%p796_p3)   ;;  %v3149_v42 = vld [vmem:[#allocation5 + $0xa0] ss:$16 sps:$4 sm:$0xff] (%p796_p3)  }
 0x2c0   : > { %1002 = vmatpush1.bf16.msra.mxu0 %v3064_v18  ;;  %1043 = vmatpush1.bf16.msra.mxu1 %v3083_v25  ;;  %v3115_v18 = vld [vmem:[#allocation5 + $0x4] ss:$16 sps:$4 sm:$0xff] (%p796_p3)   ;;  %v3125_v25 = vld [vmem:[#allocation5 + $0x20] ss:$16 sps:$4 sm:$0xff] (%p796_p3)  }
 0x2c1   : > { %1003 = vmatprep.subr.bf16.mxu0 %v3066_v19  ;;  %1044 = vmatprep.subr.bf16.mxu1 %v3086_v26  ;;  %v3117_v19 = vld [vmem:[#allocation5 + $0xc] ss:$16 sps:$4 sm:$0xff] (%p796_p3)   ;;  %v3126_v26 = vld [vmem:[#allocation5 + $0x28] ss:$16 sps:$4 sm:$0xff] (%p796_p3)  }
 0x2c4   : > { %1004 = vmatpush1.bf16.msra.mxu0 %v3070_v23  ;;  %1045 = vmatpush1.bf16.msra.mxu1 %v3089_v29  ;;  %v3121_v23 = vld [vmem:[#allocation5 + $0x24] ss:$16 sps:$4 sm:$0xff] (%p796_p3)   ;;  %v3131_v29 = vld [vmem:[#allocation5 + $0x40] ss:$16 sps:$4 sm:$0xff] (%p796_p3)  }
 0x2c5   : > { %1005 = vmatprep.subr.bf16.mxu0 %v3072_v24  ;;  %1046 = vmatprep.subr.bf16.mxu1 %v3090_v30  ;;  %v3123_v24 = vld [vmem:[#allocation5 + $0x2c] ss:$16 sps:$4 sm:$0xff] (%p796_p3)   ;;  %v3132_v30 = vld [vmem:[#allocation5 + $0x48] ss:$16 sps:$4 sm:$0xff] (%p796_p3)  }
 0x2c8   : > { %1006 = vmatpush1.bf16.msra.mxu0 %v3076_v27  ;;  %1047 = vmatpush1.bf16.msra.mxu1 %v3092_v33  ;;  %v3127_v27 = vld [vmem:[#allocation5 + $0x44] ss:$16 sps:$4 sm:$0xff] (%p796_p3)   ;;  %v3137_v33 = vld [vmem:[#allocation5 + $0x60] ss:$16 sps:$4 sm:$0xff] (%p796_p3)  }
 0x2c9   : > { %1007 = vmatprep.subr.bf16.mxu0 %v3078_v28  ;;  %1048 = vmatprep.subr.bf16.mxu1 %v3093_v34  ;;  %v3129_v28 = vld [vmem:[#allocation5 + $0x4c] ss:$16 sps:$4 sm:$0xff] (%p796_p3)   ;;  %v3138_v34 = vld [vmem:[#allocation5 + $0x68] ss:$16 sps:$4 sm:$0xff] (%p796_p3)  }
 0x2cc   : > { %1008 = vmatpush1.bf16.msra.mxu0 %v3082_v31  ;;  %1049 = vmatpush1.bf16.msra.mxu1 %v3095_v37  ;;  %v3133_v31 = vld [vmem:[#allocation5 + $0x64] ss:$16 sps:$4 sm:$0xff] (%p796_p3)   ;;  %v3143_v37 = vld [vmem:[#allocation5 + $0x80] ss:$16 sps:$4 sm:$0xff] (%p796_p3)  }
 0x2cd   : > { %1009 = vmatprep.subr.bf16.mxu0 %v3084_v32  ;;  %1050 = vmatprep.subr.bf16.mxu1 %v3096_v39  ;;  %v3135_v32 = vld [vmem:[#allocation5 + $0x6c] ss:$16 sps:$4 sm:$0xff] (%p796_p3)   ;;  %v3144_v39 = vld [vmem:[#allocation5 + $0x88] ss:$16 sps:$4 sm:$0xff] (%p796_p3)  }
 0x2d0   : > { %1010 = vmatpush1.bf16.msra.mxu0 %v3088_v35  ;;  %1051 = vmatpush1.bf16.msra.mxu1 %v3098_v41  ;;  %v3139_v35 = vld [vmem:[#allocation5 + $0x84] ss:$16 sps:$4 sm:$0xff] (%p796_p3)   ;;  %v3147_v41 = vld [vmem:[#allocation5 + $0xac] ss:$16 sps:$4 sm:$0xff] (%p796_p3)  }
 0x2d1   :  { %1331 = vmatprep.subr.bf16.mxu0 (%p796_p3), %v3115_v18  ;;  %1372 = vmatprep.subr.bf16.mxu1 (%p796_p3), %v3117_v19  ;;  %v3201_v18 = vld [vmem:[#allocation8 + $0xc4] ss:$16 sps:$4 sm:$0xff] (%p796_p3)   ;;  %v3204_v19 = vld [vmem:[#allocation8 + $0xcc] ss:$16 sps:$4 sm:$0xff] (%p796_p3)  }
 0x2d3   : > { %1028 = vmatmul.mubr.bf16.vlgmr.msra.gmra.mrb[0].mxu0 %v801_v40  ;;  %1069 = vmatmul.mubr.bf16.vlgmr.msra.gmra.mrb[0].mxu1 %v801_v40  ;;  %v3145_v40 = vld [vmem:[#allocation5 + $0xa4] ss:$16 sps:$4 sm:$0xff] (%p796_p3)  }
 0x2d4   :  { %1363 = vmatprep.mubr.bf16.mxu0 (%p796_p3), %v3453_v20  ;;  %1404 = vmatprep.mubr.bf16.mxu1 (%p796_p3), %v3453_v20 }
 0x2d5   :  { %1332 = vmatpush1.bf16.msra.mxu0 (%p796_p3), %v3119_v21  ;;  %1373 = vmatpush1.bf16.msra.mxu1 (%p796_p3), %v3120_v22  ;;  %v3202_v21 = vld [vmem:[#allocation8 + $0xc8] ss:$16 sps:$4 sm:$0xff] (%p796_p3)   ;;  %v3207_v22 = vld [vmem:[#allocation8 + $0xe4] ss:$16 sps:$4 sm:$0xff] (%p796_p3)  }
 0x2d6   :  { %1333 = vmatprep.subr.bf16.mxu0 (%p796_p3), %v3121_v23  ;;  %1374 = vmatprep.subr.bf16.mxu1 (%p796_p3), %v3123_v24  ;;  %v3210_v23 = vld [vmem:[#allocation8 + $0xec] ss:$16 sps:$4 sm:$0xff] (%p796_p3)   ;;  %v3205_v24 = vld [vmem:[#allocation8 + $0xe0] ss:$16 sps:$4 sm:$0xff] (%p796_p3)  }
 0x2d9   :  { %1334 = vmatpush1.bf16.msra.mxu0 (%p796_p3), %v3125_v25  ;;  %1375 = vmatpush1.bf16.msra.mxu1 (%p796_p3), %v3126_v26  ;;  %v3208_v25 = vld [vmem:[#allocation8 + $0xe8] ss:$16 sps:$4 sm:$0xff] (%p796_p3)  }
 0x2da   :  { %1335 = vmatprep.subr.bf16.mxu0 (%p796_p3), %v3127_v27  ;;  %1376 = vmatprep.subr.bf16.mxu1 (%p796_p3), %v3129_v28  ;;  %v1415_v28 = vld [vmem:[%s3690_s2] sm:$0xf] (%p796_p3) }
 0x2dd   :  { %1336 = vmatpush1.bf16.msra.mxu0 (%p796_p3), %v3131_v29  ;;  %1377 = vmatpush1.bf16.msra.mxu1 (%p796_p3), %v3132_v30  ;;  %v1694_v29 = vrot.slane (%p796_p3), %v1415_v28, %v3541_v11  ;;  %v1702_v30 = vrot.slane (%p796_p3), %v1415_v28, %v3543_v12 }
 0x2de   :  { %1337 = vmatprep.subr.bf16.mxu0 (%p796_p3), %v3133_v31  ;;  %1378 = vmatprep.subr.bf16.mxu1 (%p796_p3), %v3135_v32  ;;  %v1698_v31 = vrot.slane (%p796_p3), %v1415_v28, %v3548_v14  ;;  %v1706_v32 = vrot.slane (%p796_p3), %v1415_v28, %v3550_v15 }
 0x2e1   :  { %1338 = vmatpush1.bf16.msra.mxu0 (%p796_p3), %v3137_v33  ;;  %1379 = vmatpush1.bf16.msra.mxu1 (%p796_p3), %v3138_v34 }
 0x2e2   :  { %1339 = vmatprep.subr.bf16.mxu0 (%p796_p3), %v3139_v35  ;;  %1380 = vmatprep.subr.bf16.mxu1 (%p796_p3), %v3141_v36 }
 0x2e5   :  { %1340 = vmatpush1.bf16.msra.mxu0 (%p796_p3), %v3143_v37  ;;  %1381 = vmatpush1.bf16.msra.mxu1 (%p796_p3), %v3144_v39 }
 0x2e6   :  { %1341 = vmatprep.subr.bf16.mxu0 (%p796_p3), %v3145_v40  ;;  %1382 = vmatprep.subr.bf16.mxu1 (%p796_p3), %v3147_v41 }
 0x2e9   :  { %1342 = vmatpush1.bf16.msra.mxu0 (%p796_p3), %v3149_v42 }
 0x3a6   : > { %v1029_v45 = vpop.f32.mrb[0].mxu0  ;;  %v1070_v55 = vpop.f32.mrb[0].mxu1 }
 0x3a7   : > { %v1098_v46 = vadd.f32 %v1081_v43, %v1029_v45  ;;  %v1031_v47 = vpop.f32.mrb[1].mxu0  ;;  %v1100_v56 = vadd.f32 %v1089_v50, %v1070_v55  ;;  %v1072_v57 = vpop.f32.mrb[1].mxu1  ;;  %v3150_v43 = vld [vmem:[#allocation5 + $0xa8] ss:$16 sps:$4 sm:$0xff] (%p796_p3)   ;;  %v3153_v45 = vld [vmem:[#allocation5 + $0xcc] ss:$16 sps:$4 sm:$0xff] (%p796_p3)  }
 0x3a8   : > { %v1099_v48 = vadd.f32 %v1085_v44, %v1031_v47  ;;  %v1033_v49 = vpop.f32.mrb[2].mxu0  ;;  %v1101_v58 = vadd.f32 %v1093_v53, %v1072_v57  ;;  %v1074_v59 = vpop.f32.mrb[2].mxu1  ;;  %v3151_v44 = vld [vmem:[#allocation5 + $0xc4] ss:$16 sps:$4 sm:$0xff] (%p796_p3)   ;;  %1383 = vmatpush1.bf16.msra.mxu1 (%p796_p3), %v3150_v43  ;;  %v3156_v47 = vld [vmem:[#allocation5 + $0xc8] ss:$16 sps:$4 sm:$0xff] (%p796_p3)  }
 0x3a9   : > { %v2645_v51 = vmul.f32 -1.442695, %v1098_v46  ;;  %v1034_v52 = vpop.f32.mrb[3].mxu0  ;;  %v1075_v60 = vpop.f32.mrb[3].mxu1  ;;  %v3155_v46 = vld [vmem:[#allocation5 + $0xc0] ss:$16 sps:$4 sm:$0xff] (%p796_p3)   ;;  %1343 = vmatprep.subr.bf16.mxu0 (%p796_p3), %v3151_v44  ;;  %1384 = vmatprep.subr.bf16.mxu1 (%p796_p3), %v3153_v45 }
 0x3aa   : > { %v2646_v54 = vmul.f32 -1.442695, %v1099_v48  ;;  %v2647_v61 = vmul.f32 -1.442695, %v1101_v58  ;;  %v3157_v48 = vld [vmem:[#allocation5 + $0xe4] ss:$16 sps:$4 sm:$0xff] (%p796_p3)   ;;  %1344 = vmatpush1.bf16.msra.mxu0 (%p796_p3), %v3155_v46 }
 0x3ab   : > { %3099 = vpow2.f32 %v2645_v51  ;;  %v3159_v49 = vld [vmem:[#allocation5 + $0xec] ss:$16 sps:$4 sm:$0xff] (%p796_p3)   ;;  %v3161_v50 = vld [vmem:[#allocation5 + $0xe0] ss:$16 sps:$4 sm:$0xff] (%p796_p3)   ;;  %v3162_v51 = vld [vmem:[#allocation5 + $0xe8] ss:$16 sps:$4 sm:$0xff] (%p796_p3)   ;;  %1345 = vmatprep.subr.bf16.mxu0 (%p796_p3), %v3157_v48 }
 0x3ac   : > { %3101 = vpow2.f32 %v2646_v54  ;;  %1385 = vmatpush1.bf16.msra.mxu1 (%p796_p3), %v3156_v47  ;;  %v1137_v52 = vld [vmem:[#allocation10] sm:$0xff] (%p796_p3)  ;;  %v3168_v54 = vld [vmem:[#allocation8 + $0xc] ss:$16 sps:$4 sm:$0xff] (%p796_p3)   ;;  %v3166_v57 = vld [vmem:[#allocation8 + $0x8] ss:$16 sps:$4 sm:$0xff] (%p796_p3)  }
 0x3ad   : > { %3103 = vpow2.f32 %v2647_v61  ;;  %1386 = vmatprep.subr.bf16.mxu1 (%p796_p3), %v3159_v49  ;;  %v3165_v53 = vld [vmem:[#allocation8 + $0x4] ss:$16 sps:$4 sm:$0xff] (%p796_p3)   ;;  %v3163_v55 = vld [vmem:[#allocation8] ss:$16 sps:$4 sm:$0xff] (%p796_p3)   ;;  %v3174_v59 = vld [vmem:[#allocation8 + $0x2c] ss:$16 sps:$4 sm:$0xff] (%p796_p3)  }
 0x3ae   : > { %3105 = vtanh.f32 %v1100_v56  ;;  %v1138_v56 = vpack.c.bf16 (%p796_p3), %v1137_v52, %v1137_v52  ;;  %1346 = vmatpush1.bf16.msra.mxu0 (%p796_p3), %v3161_v50  ;;  %v3171_v58 = vld [vmem:[#allocation8 + $0x24] ss:$16 sps:$4 sm:$0xff] (%p796_p3)   ;;  %v3169_v60 = vld [vmem:[#allocation8 + $0x20] ss:$16 sps:$4 sm:$0xff] (%p796_p3)   ;;  %v3172_v61 = vld [vmem:[#allocation8 + $0x28] ss:$16 sps:$4 sm:$0xff] (%p796_p3)  }
 0x3af   :  { %1608 = vmatprep.subr.bf16.mxu0 (%p796_p3), %v3165_v53 }
 0x3b0   :  { %1387 = vmatpush1.bf16.msra.mxu1 (%p796_p3), %v3162_v51 }
 0x3b1   :  { %1649 = vmatprep.subr.bf16.mxu1 (%p796_p3), %v3168_v54  ;;  %1364 = vmatmul.mubr.bf16.vlgmr.msra.gmra.mrb[0].mxu0 (%p796_p3), %v1138_v56 }
 0x3b2   :  { %1609 = vmatpush1.bf16.msra.mxu0 (%p796_p3), %v3163_v55  ;;  %1640 = vmatprep.mubr.bf16.mxu0 (%p796_p3), %v3453_v20 }
 0x3b3   :  { %1405 = vmatmul.mubr.bf16.vlgmr.msra.gmra.mrb[0].mxu1 (%p796_p3), %v1138_v56  ;;  %1610 = vmatprep.subr.bf16.mxu0 (%p796_p3), %v3171_v58 }
 0x3b4   :  { %1650 = vmatpush1.bf16.msra.mxu1 (%p796_p3), %v3166_v57  ;;  %1681 = vmatprep.mubr.bf16.mxu1 (%p796_p3), %v3453_v20  ;;  %v3199_v20 = vld [vmem:[#allocation8 + $0xc0] ss:$16 sps:$4 sm:$0xff] (%p796_p3)  }
 0x3b5   : > { %v3100_v62 = vpop.eup %3099  ;;  %1651 = vmatprep.subr.bf16.mxu1 (%p796_p3), %v3174_v59 }
 0x3b6   : > { %v3102_v63 = vpop.eup %3101  ;;  %v1110_v1 = vadd.f32 1.0, %v3100_v62  ;;  %v3177_v62 = vld [vmem:[#allocation8 + $0x44] ss:$16 sps:$4 sm:$0xff] (%p796_p3)   ;;  %1611 = vmatpush1.bf16.msra.mxu0 (%p796_p3), %v3169_v60 }
 0x3b7   : > { %v1117_v2 = vadd.f32 1.0, %v3102_v63  ;;  %v3104_v3 = vpop.eup %3103  ;;  %v3180_v63 = vld [vmem:[#allocation8 + $0x4c] ss:$16 sps:$4 sm:$0xff] (%p796_p3)   ;;  %1612 = vmatprep.subr.bf16.mxu0 (%p796_p3), %v3177_v62 }
 0x3b8   : > { %3107 = vrcp.f32 %v1110_v1  ;;  %v3106_v4 = vpop.eup %3105  ;;  %v1126_v6 = vadd.f32 1.0, %v3104_v3  ;;  %v3175_v1 = vld [vmem:[#allocation8 + $0x40] ss:$16 sps:$4 sm:$0xff] (%p796_p3)   ;;  %1652 = vmatpush1.bf16.msra.mxu1 (%p796_p3), %v3172_v61  ;;  %v3183_v3 = vld [vmem:[#allocation8 + $0x64] ss:$16 sps:$4 sm:$0xff] (%p796_p3)  }
 0x3b9   : > { %3109 = vrcp.f32 %v1117_v2  ;;  %v3178_v2 = vld [vmem:[#allocation8 + $0x48] ss:$16 sps:$4 sm:$0xff] (%p796_p3)   ;;  %1653 = vmatprep.subr.bf16.mxu1 (%p796_p3), %v3180_v63 }
 0x3ba   : > { %3111 = vrcp.f32 %v1126_v6  ;;  %1613 = vmatpush1.bf16.msra.mxu0 (%p796_p3), %v3175_v1  ;;  %v3189_v6 = vld [vmem:[#allocation8 + $0x84] ss:$16 sps:$4 sm:$0xff] (%p796_p3)  }
 0x3bb   :  { %1614 = vmatprep.subr.bf16.mxu0 (%p796_p3), %v3183_v3 }
 0x3bc   :  { %1654 = vmatpush1.bf16.msra.mxu1 (%p796_p3), %v3178_v2 }
 0x3c2   : > { %v3108_v0 = vpop.eup %3107 }
 0x3c3   : > { %v3110_v7 = vpop.eup %3109  ;;  %v1131_v8 = vmul.f32 %v3108_v0, %v3106_v4  ;;  %v3186_v4 = vld [vmem:[#allocation8 + $0x6c] ss:$16 sps:$4 sm:$0xff] (%p796_p3)   ;;  %v3184_v0 = vld [vmem:[#allocation8 + $0x68] ss:$16 sps:$4 sm:$0xff] (%p796_p3)  }
 0x3c4   : > { %v1130_v9 = vmul.f32 %v3110_v7, %v1129_v5  ;;  %v3112_v13 = vpop.eup %3111  ;;  %v3181_v5 = vld [vmem:[#allocation8 + $0x60] ss:$16 sps:$4 sm:$0xff] (%p796_p3)   ;;  %1655 = vmatprep.subr.bf16.mxu1 (%p796_p3), %v3186_v4  ;;  %v3192_v7 = vld [vmem:[#allocation8 + $0x8c] ss:$16 sps:$4 sm:$0xff] (%p796_p3)  }
 0x3c5   :  { %1615 = vmatpush1.bf16.msra.mxu0 (%p796_p3), %v3181_v5  ;;  %1656 = vmatpush1.bf16.msra.mxu1 (%p796_p3), %v3184_v0 }
 0x3c6   : > { %v1132_v10 = vadd.f32 %v1131_v8, %v1130_v9  ;;  %v3187_v8 = vld [vmem:[#allocation8 + $0x80] ss:$16 sps:$4 sm:$0xff] (%p796_p3)   ;;  %v3190_v9 = vld [vmem:[#allocation8 + $0x88] ss:$16 sps:$4 sm:$0xff] (%p796_p3)   ;;  %1616 = vmatprep.subr.bf16.mxu0 (%p796_p3), %v3189_v6  ;;  %1657 = vmatprep.subr.bf16.mxu1 (%p796_p3), %v3192_v7 }
 0x3c8   : > { %1133 = vst [vmem:[#allocation3] sm:$0xff] %v1132_v10  ;;  %3113 = vtanh.f32 %v1132_v10  ;;  %v3195_v10 = vld [vmem:[#allocation8 + $0xa4] ss:$16 sps:$4 sm:$0xff] (%p796_p3)  }
 0x3c9   :  { %1617 = vmatpush1.bf16.msra.mxu0 (%p796_p3), %v3187_v8  ;;  %1658 = vmatpush1.bf16.msra.mxu1 (%p796_p3), %v3190_v9 }
 0x3ca   :  { %1618 = vmatprep.subr.bf16.mxu0 (%p796_p3), %v3195_v10 }
 0x3cf   :  { %798 = sbr.rel (!%p796_p3) target bundleno = 689 (0x2b1), region = 87  ;;  %v1746_v55 = vld [vmem:[#allocation3] sm:$0xff] (%p796_p3) }
 0x3d2   : > { %v3114_v16 = vpop.eup %3113 }
 0x3d3   : > { %v1135_v17 = vmul.f32 %v3114_v16, %v3112_v13  ;;  %v3198_v13 = vld [vmem:[#allocation8 + $0xac] ss:$16 sps:$4 sm:$0xff] (%p796_p3)   ;;  %v3193_v16 = vld [vmem:[#allocation8 + $0xa0] ss:$16 sps:$4 sm:$0xff] (%p796_p3)  }
 0x3d4   :  { %1659 = vmatprep.subr.bf16.mxu1 (%p796_p3), %v3198_v13  ;;  %1619 = vmatpush1.bf16.msra.mxu0 (%p796_p3), %v3193_v16 }
 0x3d5   : > { %1136 = vst [vmem:[#allocation2] sm:$0xff] %v1135_v17  ;;  %v3196_v17 = vld [vmem:[#allocation8 + $0xa8] ss:$16 sps:$4 sm:$0xff] (%p796_p3)   ;;  %1620 = vmatprep.subr.bf16.mxu0 (%p796_p3), %v3201_v18 }
 0x3d6   :  { %1660 = vmatpush1.bf16.msra.mxu1 %v3196_v17 }
 0x3d7   :  { %1661 = vmatprep.subr.bf16.mxu1 %v3204_v19 }
 0x3d8   :  { %1621 = vmatpush1.bf16.msra.mxu0 %v3199_v20 }
 0x3d9   :  { %1622 = vmatprep.subr.bf16.mxu0 %v3207_v22 }
 0x3da   :  { %1662 = vmatpush1.bf16.msra.mxu1 %v3202_v21 }
 0x3db   :  { %1663 = vmatprep.subr.bf16.mxu1 %v3210_v23 }
 0x3dc   :  { %v1413_v26 = vld [vmem:[#allocation2] sm:$0xff]  ;;  %1623 = vmatpush1.bf16.msra.mxu0 %v3205_v24 }
 0x3dd   :  { %v1414_v27 = vpack.c.bf16 %v1413_v26, %v1413_v26 }
 0x3de   :  { %1664 = vmatpush1.bf16.msra.mxu1 %v3208_v25 }
 0x3df   :  { %1641 = vmatmul.mubr.bf16.vlgmr.msra.gmra.mrb[0].mxu0 %v1414_v27 }
 0x3e1   :  { %1682 = vmatmul.mubr.bf16.vlgmr.msra.gmra.mrb[0].mxu1 %v1414_v27 }
 0x4b2   :  { %v1642_v33 = vpop.f32.mrb[0].mxu0 }
 0x4b3   :  { %v1711_v35 = vadd.f32 %v1694_v29, %v1642_v33  ;;  %v1644_v37 = vpop.f32.mrb[1].mxu0 }
 0x4b4   :  { %v1683_v34 = vpop.f32.mrb[0].mxu1  ;;  %v1712_v40 = vadd.f32 %v1698_v31, %v1644_v37  ;;  %v1646_v42 = vpop.f32.mrb[2].mxu0 }
 0x4b5   :  { %v1713_v36 = vadd.f32 %v1702_v30, %v1683_v34  ;;  %v1685_v39 = vpop.f32.mrb[1].mxu1  ;;  %v2712_v44 = vmul.f32 -1.442695, %v1711_v35  ;;  %v1647_v45 = vpop.f32.mrb[3].mxu0 }
 0x4b6   :  { %v1714_v41 = vadd.f32 %v1706_v32, %v1685_v39  ;;  %v1687_v43 = vpop.f32.mrb[2].mxu1  ;;  %v2713_v47 = vmul.f32 -1.442695, %v1712_v40 }
 0x4b7   :  { %v1688_v46 = vpop.f32.mrb[3].mxu1  ;;  %3211 = vpow2.f32 %v2712_v44 }
 0x4b8   :  { %3213 = vpow2.f32 %v2713_v47  ;;  %v2714_v48 = vmul.f32 -1.442695, %v1714_v41 }
 0x4ba   :  { %3215 = vpow2.f32 %v2714_v48 }
 0x4bb   :  { %3217 = vtanh.f32 %v1713_v36 }
 0x4c1   :  { %v3212_v49 = vpop.eup %3211 }
 0x4c2   :  { %v3214_v50 = vpop.eup %3213  ;;  %v1727_v51 = vadd.f32 1.0, %v3212_v49 }
 0x4c3   :  { %v1734_v52 = vadd.f32 1.0, %v3214_v50 }
 0x4c4   :  { %3219 = vrcp.f32 %v1727_v51  ;;  %v3216_v53 = vpop.eup %3215 }
 0x4c5   :  { %3221 = vrcp.f32 %v1734_v52  ;;  %v3218_v54 = vpop.eup %3217  ;;  %v1743_v59 = vadd.f32 1.0, %v3216_v53 }
 0x4c7   :  { %3223 = vrcp.f32 %v1743_v59 }
 0x4ce   :  { %v3220_v56 = vpop.eup %3219 }
 0x4cf   :  { %v3222_v57 = vpop.eup %3221  ;;  %v1748_v58 = vmul.f32 %v3220_v56, %v3218_v54 }
 0x4d0   :  { %v1747_v60 = vmul.f32 %v3222_v57, %v1746_v55 }
 0x4d1   :  { %v3224_v62 = vpop.eup %3223 }
 0x4d2   :  { %v1749_v61 = vadd.f32 %v1748_v58, %v1747_v60 }
 0x4d4   :  { %1750 = vst [vmem:[#allocation3] sm:$0xff] %v1749_v61  ;;  %3225 = vtanh.f32 %v1749_v61 }
 0x4de   :  { %v3226_v63 = vpop.eup %3225 }
 0x4df   :  { %v1752_v1 = vmul.f32 %v3226_v63, %v3224_v62 }
 0x4e1   :  { %1753 = vst [vmem:[#allocation2] sm:$0xff] %v1752_v1 }
 0x4e2 LB: > { %v3454_v2 = vmov 0   ;;  %v3455_v3 = vmov 0.0   ;;  %v3228_v4 = vld [vmem:[%s3693_s5] sm:$0xff]   ;;  %s2723_s25 = sshll.u32 %s3442_s4, 3  ;;  %vm3456_vm3 = vmmov 0   ;;  %v3229_v5 = vld [vmem:[%s3693_s5 + $0x8] sm:$0xff]   ;;  %s3442_s4 = sphi %s3618_s4, %s1759_s4  }
 0x4e3   : > { %3227 = vset.pattern.permute.xlu0 %v3454_v2  ;;  %2833 = vmatprep.subr.bf16.mxu0 %v3455_v3  ;;  %s1869_s28 = scalar_lea.vmem %s3689_s1, %s2723_s25  ;;  %v3230_v6 = vld [vmem:[%s3693_s5 + $0x10] sm:$0xff]   ;;  %v3231_v8 = vld [vmem:[%s3693_s5 + $0x18] sm:$0xff]   ;;  %v3232_v13 = vld [vmem:[%s3693_s5 + $0x20] sm:$0xff]   ;;  %v3457_v58 = vmov 1.0|1.0   ;;  %s1867_s18 = scalar_lea.vmem [#allocation10], %s2723_s25 }
 0x4e4   : > { %2849 = vmatprep.mubr.msk.bf16.mxu0 %vm3456_vm3, %v3455_v3  ;;  %2103 = vmatprep.mubr.bf16.mxu1 %v3454_v2  ;;  %v1870_v0 = vld [vmem:[%s1869_s28] sm:$0xff]  ;;  %v3233_v20 = vld [vmem:[%s3693_s5 + $0x28] sm:$0xff]   ;;  %v3234_v23 = vld [vmem:[%s3693_s5 + $0x30] sm:$0xff]   ;;  %s1759_s4 = sadd.s32 1, %s3442_s4  }
 0x4e5   : > { %2834 = vmatpush3.bf16.msra.mxu0 %v3228_v4  ;;  %1874 = vperm.xlu0 %3227, %v1870_v0   ;;  %v3236_v7 = vld [vmem:[#allocation5 + $0x4] ss:$16 sps:$4 sm:$0xff]   ;;  %v3241_v9 = vld [vmem:[#allocation5] ss:$16 sps:$4 sm:$0xff]   ;;  %v3235_v26 = vld [vmem:[%s3693_s5 + $0x38] sm:$0xff]   ;;  %p1756_p4 = scmp.ge.s32.totalorder %s1759_s4, 8  }
 0x4e6   : > { %2835 = vmatprep.subr.bf16.mxu0 %v3455_v3  ;;  %2071 = vmatprep.subr.bf16.mxu1 %v3236_v7  ;;  %v3242_v10 = vld [vmem:[#allocation5 + $0x24] ss:$16 sps:$4 sm:$0xff]   ;;  %v3247_v16 = vld [vmem:[#allocation5 + $0x20] ss:$16 sps:$4 sm:$0xff]   ;;  %v3240_v28 = vld [vmem:[#allocation5 + $0xc] ss:$16 sps:$4 sm:$0xff]  }
 0x4e7   : > { %2072 = vmatpush1.bf16.msra.mxu1 %v3241_v9  ;;  %v3248_v17 = vld [vmem:[#allocation5 + $0x44] ss:$16 sps:$4 sm:$0xff]   ;;  %v3253_v18 = vld [vmem:[#allocation5 + $0x40] ss:$16 sps:$4 sm:$0xff]   ;;  %v3238_v32 = vld [vmem:[#allocation5 + $0x8] ss:$16 sps:$4 sm:$0xff]  }
 0x4e8   : > { %2073 = vmatprep.subr.bf16.mxu1 %v3242_v10  ;;  %v3254_v19 = vld [vmem:[#allocation5 + $0x64] ss:$16 sps:$4 sm:$0xff]   ;;  %v3259_v21 = vld [vmem:[#allocation5 + $0x60] ss:$16 sps:$4 sm:$0xff]   ;;  %v3246_v33 = vld [vmem:[#allocation5 + $0x2c] ss:$16 sps:$4 sm:$0xff]  }
 0x4e9   : > { %2836 = vmatpush3.bf16.msra.mxu0 %v3229_v5  ;;  %v3260_v22 = vld [vmem:[#allocation5 + $0x84] ss:$16 sps:$4 sm:$0xff]   ;;  %v3265_v24 = vld [vmem:[#allocation5 + $0x80] ss:$16 sps:$4 sm:$0xff]   ;;  %v3244_v36 = vld [vmem:[#allocation5 + $0x28] ss:$16 sps:$4 sm:$0xff]  }
 0x4ea   : > { %2837 = vmatprep.subr.bf16.mxu0 %v3455_v3  ;;  %v3266_v25 = vld [vmem:[#allocation5 + $0xa4] ss:$16 sps:$4 sm:$0xff]   ;;  %v3271_v29 = vld [vmem:[#allocation5 + $0xa0] ss:$16 sps:$4 sm:$0xff]   ;;  %v3252_v37 = vld [vmem:[#allocation5 + $0x4c] ss:$16 sps:$4 sm:$0xff]  }
 0x4eb   : > { %2074 = vmatpush1.bf16.msra.mxu1 %v3247_v16  ;;  %v1760_v27 = vld [vmem:[#allocation2] sm:$0xff]  ;;  %v3250_v41 = vld [vmem:[#allocation5 + $0x48] ss:$16 sps:$4 sm:$0xff]   ;;  %v3258_v42 = vld [vmem:[#allocation5 + $0x6c] ss:$16 sps:$4 sm:$0xff]   ;;  %s3458_s3 = smov (%p1756_p4), [#allocation10]  }
 0x4ec   : > { %2075 = vmatprep.subr.bf16.mxu1 %v3248_v17  ;;  %v3655_v30 = vpack.c.bf16 %v1760_v27, %v1760_v27  ;;  %v3272_v31 = vld [vmem:[#allocation5 + $0xc4] ss:$16 sps:$4 sm:$0xff]   ;;  %v3277_v34 = vld [vmem:[#allocation5 + $0xc0] ss:$16 sps:$4 sm:$0xff]   ;;  %v3256_v43 = vld [vmem:[#allocation5 + $0x68] ss:$16 sps:$4 sm:$0xff]  }
 0x4ed   : > { %2838 = vmatpush3.bf16.msra.mxu0 %v3230_v6  ;;  %v3278_v35 = vld [vmem:[#allocation5 + $0xe4] ss:$16 sps:$4 sm:$0xff]   ;;  %v3283_v39 = vld [vmem:[#allocation5 + $0xe0] ss:$16 sps:$4 sm:$0xff]   ;;  %v3264_v44 = vld [vmem:[#allocation5 + $0x8c] ss:$16 sps:$4 sm:$0xff]  }
 0x4ee   : > { %2839 = vmatprep.subr.bf16.mxu0 %v3455_v3  ;;  %v3286_v40 = vld [vmem:[#allocation8 + $0x4] ss:$16 sps:$4 sm:$0xff]   ;;  %v3262_v45 = vld [vmem:[#allocation5 + $0x88] ss:$16 sps:$4 sm:$0xff]   ;;  %v3270_v46 = vld [vmem:[#allocation5 + $0xac] ss:$16 sps:$4 sm:$0xff]  }
 0x4ef   : > { %2076 = vmatpush1.bf16.msra.mxu1 %v3253_v18  ;;  %v3268_v47 = vld [vmem:[#allocation5 + $0xa8] ss:$16 sps:$4 sm:$0xff]   ;;  %v3276_v48 = vld [vmem:[#allocation5 + $0xcc] ss:$16 sps:$4 sm:$0xff]   ;;  %v3284_v54 = vld [vmem:[#allocation8] ss:$16 sps:$4 sm:$0xff]  }
 0x4f0   : > { %2077 = vmatprep.subr.bf16.mxu1 %v3254_v19  ;;  %v3274_v49 = vld [vmem:[#allocation5 + $0xc8] ss:$16 sps:$4 sm:$0xff]   ;;  %v3282_v50 = vld [vmem:[#allocation5 + $0xec] ss:$16 sps:$4 sm:$0xff]   ;;  %v3292_v56 = vld [vmem:[#allocation8 + $0x24] ss:$16 sps:$4 sm:$0xff]  }
 0x4f1   : > { %2840 = vmatpush3.bf16.msra.mxu0 %v3231_v8  ;;  %v3280_v51 = vld [vmem:[#allocation5 + $0xe8] ss:$16 sps:$4 sm:$0xff]   ;;  %v3289_v52 = vld [vmem:[#allocation8 + $0xc] ss:$16 sps:$4 sm:$0xff]   ;;  %v3290_v59 = vld [vmem:[#allocation8 + $0x20] ss:$16 sps:$4 sm:$0xff]  }
 0x4f2   : > { %2841 = vmatprep.subr.bf16.mxu0 %v3455_v3  ;;  %v3287_v55 = vld [vmem:[#allocation8 + $0x8] ss:$16 sps:$4 sm:$0xff]   ;;  %v3295_v57 = vld [vmem:[#allocation8 + $0x2c] ss:$16 sps:$4 sm:$0xff]   ;;  %v3298_v61 = vld [vmem:[#allocation8 + $0x44] ss:$16 sps:$4 sm:$0xff]  }
 0x4f3   : > { %2078 = vmatpush1.bf16.msra.mxu1 %v3259_v21  ;;  %v3293_v60 = vld [vmem:[#allocation8 + $0x28] ss:$16 sps:$4 sm:$0xff]   ;;  %v3301_v62 = vld [vmem:[#allocation8 + $0x4c] ss:$16 sps:$4 sm:$0xff]   ;;  %v3296_v63 = vld [vmem:[#allocation8 + $0x40] ss:$16 sps:$4 sm:$0xff]  }
 0x4f4   : > { %2079 = vmatprep.subr.bf16.mxu1 %v3260_v22  ;;  %v3299_v1 = vld [vmem:[#allocation8 + $0x48] ss:$16 sps:$4 sm:$0xff]   ;;  %v3307_v4 = vld [vmem:[#allocation8 + $0x6c] ss:$16 sps:$4 sm:$0xff]   ;;  %v3302_v5 = vld [vmem:[#allocation8 + $0x60] ss:$16 sps:$4 sm:$0xff]  }
 0x4f5   : > { %2842 = vmatpush3.bf16.msra.mxu0 %v3232_v13  ;;  %v3305_v0 = vld [vmem:[#allocation8 + $0x68] ss:$16 sps:$4 sm:$0xff]   ;;  %v3310_v6 = vld [vmem:[#allocation8 + $0x84] ss:$16 sps:$4 sm:$0xff]   ;;  %v3313_v7 = vld [vmem:[#allocation8 + $0x8c] ss:$16 sps:$4 sm:$0xff]  }
 0x4f6   : > { %2843 = vmatprep.subr.bf16.mxu0 %v3455_v3  ;;  %v3308_v8 = vld [vmem:[#allocation8 + $0x80] ss:$16 sps:$4 sm:$0xff]   ;;  %v3316_v9 = vld [vmem:[#allocation8 + $0xa4] ss:$16 sps:$4 sm:$0xff]   ;;  %v3319_v10 = vld [vmem:[#allocation8 + $0xac] ss:$16 sps:$4 sm:$0xff]  }
 0x4f7   : > { %2080 = vmatpush1.bf16.msra.mxu1 %v3265_v24  ;;  %v3314_v13 = vld [vmem:[#allocation8 + $0xa0] ss:$16 sps:$4 sm:$0xff]   ;;  %v3317_v16 = vld [vmem:[#allocation8 + $0xa8] ss:$16 sps:$4 sm:$0xff]   ;;  %v3322_v17 = vld [vmem:[#allocation8 + $0xc4] ss:$16 sps:$4 sm:$0xff]  }
 0x4f8   : > { %2081 = vmatprep.subr.bf16.mxu1 %v3266_v25  ;;  %v3325_v18 = vld [vmem:[#allocation8 + $0xcc] ss:$16 sps:$4 sm:$0xff]   ;;  %v3320_v19 = vld [vmem:[#allocation8 + $0xc0] ss:$16 sps:$4 sm:$0xff]   ;;  %v3328_v21 = vld [vmem:[#allocation8 + $0xe4] ss:$16 sps:$4 sm:$0xff]  }
 0x4f9   : > { %2844 = vmatpush3.bf16.msra.mxu0 %v3233_v20  ;;  %v3323_v20 = vld [vmem:[#allocation8 + $0xc8] ss:$16 sps:$4 sm:$0xff]   ;;  %v3331_v22 = vld [vmem:[#allocation8 + $0xec] ss:$16 sps:$4 sm:$0xff]   ;;  %s2499_s21 = sshll.u32 (%p1756_p4), %s3458_s3, 4  ;;  %s2500_s21 = int_to_ptr.vmem [resolvable:$true] %s2499_s21 }
 0x4fa   : > { %2845 = vmatprep.subr.bf16.mxu0 %v3455_v3  ;;  %v3329_v24 = vld [vmem:[#allocation8 + $0xe8] ss:$16 sps:$4 sm:$0xff]   ;;  %s3392_s22 = scalar_lea.vmem (%p1756_p4), %s2500_s21, 1024  ;;  %p3397_p6 = scmp.lt.s32.totalorder (%p1756_p4), %s2500_s21, %s2500_s21 }
 0x4fb   : > { %2082 = vmatpush1.bf16.msra.mxu1 %v3271_v29  ;;  %v2155_v29 = vld [vmem:[%s3690_s2] sm:$0xf]  ;;  %p3393_p5 = scmp.ne.s32.totalorder (%p1756_p4), %s2500_s21, %s3392_s22  ;;  %p3398_p7 = scmp.lt.s32.totalorder (%p1756_p4), %s3392_s22, %s3392_s22 }
 0x4fc   : > { %2083 = vmatprep.subr.bf16.mxu1 %v3272_v31  ;;  %v2434_v31 = vrot.slane %v2155_v29, %v3541_v11 }
 0x4fd   : > { %2846 = vmatpush3.bf16.msra.mxu0 %v3234_v23  ;;  %v3326_v23 = vld [vmem:[#allocation8 + $0xe0] ss:$16 sps:$4 sm:$0xff]   ;;  %p3399_p8 = por (%p1756_p4), %p3398_p7, %p3397_p6 }
 0x4fe   : > { %2847 = vmatprep.subr.bf16.mxu0 %v3455_v3  ;;  %v3304_v3 = vld [vmem:[#allocation8 + $0x64] ss:$16 sps:$4 sm:$0xff]  }
 0x4ff   : > { %2084 = vmatpush1.bf16.msra.mxu1 %v3277_v34  ;;  %v2446_v34 = vrot.slane %v2155_v29, %v3550_v15  ;;  %p3400_p9 = pnand (%p1756_p4), %p3399_p8, %p3393_p5 }
 0x500   : > { %2085 = vmatprep.subr.bf16.mxu1 %v3278_v35 }
 0x501   : > { %2848 = vmatpush3.bf16.msra.mxu0 %v3235_v26 }
 0x502   : > { %2112 = vmatprep.subr.bf16.mxu0 %v3240_v28 }
 0x503   : > { %2086 = vmatpush1.bf16.msra.mxu1 %v3283_v39 }
 0x504   : > { %2850 = vmatmul.mubr.bf16.vlgmr.msra.gmra.mrb[0].mxu0 %v3655_v30  ;;  %2348 = vmatprep.subr.bf16.mxu1 %v3286_v40 }
 0x505   : > { %2113 = vmatpush1.bf16.msra.mxu0 %v3238_v32  ;;  %2144 = vmatprep.mubr.bf16.mxu0 %v3454_v2  ;;  %v2442_v32 = vrot.slane %v2155_v29, %v3543_v12 }
 0x506   : > { %2114 = vmatprep.subr.bf16.mxu0 %v3246_v33  ;;  %v2438_v33 = vrot.slane %v2155_v29, %v3548_v14 }
 0x509   : > { %2115 = vmatpush1.bf16.msra.mxu0 %v3244_v36 }
 0x50a   : > { %2116 = vmatprep.subr.bf16.mxu0 %v3252_v37 }
 0x50d   : > { %2117 = vmatpush1.bf16.msra.mxu0 %v3250_v41 }
 0x50e   : > { %2118 = vmatprep.subr.bf16.mxu0 %v3258_v42 }
 0x511   : > { %2119 = vmatpush1.bf16.msra.mxu0 %v3256_v43 }
 0x512   : > { %2120 = vmatprep.subr.bf16.mxu0 %v3264_v44 }
 0x515   : > { %2121 = vmatpush1.bf16.msra.mxu0 %v3262_v45 }
 0x516   : > { %2122 = vmatprep.subr.bf16.mxu0 %v3270_v46 }
 0x519   : > { %2123 = vmatpush1.bf16.msra.mxu0 %v3268_v47 }
 0x51a   : > { %2124 = vmatprep.subr.bf16.mxu0 %v3276_v48 }
 0x51d   : > { %2125 = vmatpush1.bf16.msra.mxu0 %v3274_v49 }
 0x51e   : > { %2126 = vmatprep.subr.bf16.mxu0 %v3282_v50 }
 0x521   : > { %2127 = vmatpush1.bf16.msra.mxu0 %v3280_v51 }
 0x522   : > { %2389 = vmatprep.subr.bf16.mxu0 %v3289_v52 }
 0x564   : > { %v1875_v53 = vpop.permute.xlu0 %1874 }
 0x565   : > { %vm1876_vm4 = vcmp.eq.s32.totalorder %v3535_v38, %v1875_v53 }
 0x566   : > { %vm2756_vm5 = vmpackc.low %vm1876_vm4, %vm1876_vm4 }
 0x567   : > { %2757 = vmatmul.mubr.msk.bf16.vlgmr.msra.gmra.mrb[0].mxu1 %vm2756_vm5, %v3457_v58  ;;  %2759 = vmatmul.mubr.msk.bf16.vlgmr.msra.gmra.mrb[4].mxu0 %vm2756_vm5, %v3457_v58 }
 0x568   : > { %2349 = vmatpush1.bf16.msra.mxu1 %v3284_v54  ;;  %2390 = vmatpush1.bf16.msra.mxu0 %v3287_v55 }
 0x569   : > { %2350 = vmatprep.subr.bf16.mxu1 %v3292_v56  ;;  %2391 = vmatprep.subr.bf16.mxu0 %v3295_v57  ;;  %v2486_v56 = vld [vmem:[#allocation3] sm:$0xff] }
 0x56a   : > { %2380 = vmatprep.mubr.bf16.mxu1 %v3454_v2  ;;  %2421 = vmatprep.mubr.bf16.mxu0 %v3454_v2  ;;  %v3311_v2 = vld [vmem:[#allocation8 + $0x88] ss:$16 sps:$4 sm:$0xff]  }
 0x56c   : > { %2351 = vmatpush1.bf16.msra.mxu1 %v3290_v59  ;;  %2392 = vmatpush1.bf16.msra.mxu0 %v3293_v60 }
 0x56d   : > { %2352 = vmatprep.subr.bf16.mxu1 %v3298_v61  ;;  %2393 = vmatprep.subr.bf16.mxu0 %v3301_v62 }
 0x570   : > { %2353 = vmatpush1.bf16.msra.mxu1 %v3296_v63  ;;  %2394 = vmatpush1.bf16.msra.mxu0 %v3299_v1 }
 0x571   : > { %2354 = vmatprep.subr.bf16.mxu1 %v3304_v3  ;;  %2395 = vmatprep.subr.bf16.mxu0 %v3307_v4 }
 0x574   : > { %2355 = vmatpush1.bf16.msra.mxu1 %v3302_v5  ;;  %2396 = vmatpush1.bf16.msra.mxu0 %v3305_v0 }
 0x575   : > { %2356 = vmatprep.subr.bf16.mxu1 %v3310_v6  ;;  %2397 = vmatprep.subr.bf16.mxu0 %v3313_v7 }
 0x578   : > { %2357 = vmatpush1.bf16.msra.mxu1 %v3308_v8  ;;  %2398 = vmatpush1.bf16.msra.mxu0 %v3311_v2 }
 0x579   : > { %2358 = vmatprep.subr.bf16.mxu1 %v3316_v9  ;;  %2399 = vmatprep.subr.bf16.mxu0 %v3319_v10 }
 0x57c   : > { %2359 = vmatpush1.bf16.msra.mxu1 %v3314_v13  ;;  %2400 = vmatpush1.bf16.msra.mxu0 %v3317_v16 }
 0x57d   : > { %2360 = vmatprep.subr.bf16.mxu1 %v3322_v17  ;;  %2401 = vmatprep.subr.bf16.mxu0 %v3325_v18 }
 0x580   : > { %2361 = vmatpush1.bf16.msra.mxu1 %v3320_v19  ;;  %2402 = vmatpush1.bf16.msra.mxu0 %v3323_v20 }
 0x581   : > { %2362 = vmatprep.subr.bf16.mxu1 %v3328_v21  ;;  %2403 = vmatprep.subr.bf16.mxu0 %v3331_v22 }
 0x584   : > { %2363 = vmatpush1.bf16.msra.mxu1 %v3326_v23  ;;  %2404 = vmatpush1.bf16.msra.mxu0 %v3329_v24 }
 0x587   : > { %2381 = vmatmul.mubr.bf16.vlgmr.msra.gmra.mrb[0].mxu1 %v3655_v30  ;;  %2422 = vmatmul.mubr.bf16.vlgmr.msra.gmra.mrb[4].mxu0 %v3655_v30 }
 0x5d7   : > { %v1860_v25 = vpop.f32.mrb[0].mxu0 }
 0x5d8   : > { %1868 = vst [vmem:[%s1867_s18] sm:$0xff] %v1860_v25  ;;  %v2851_v26 = vpop.f32.mrb[1].mxu0 }
 0x5d9   : > { %v1863_v27 = vpop.f32.mrb[2].mxu0 }
 0x5da   : > { %v2852_v28 = vpop.f32.mrb[3].mxu0 }
 0x65a   : > { %v2382_v30 = vpop.f32.mrb[0].mxu1  ;;  %v2423_v35 = vpop.f32.mrb[4].mxu0 }
 0x65b   : > { %v2451_v36 = vadd.f32 %v2434_v31, %v2382_v30  ;;  %v2453_v37 = vadd.f32 %v2442_v32, %v2423_v35  ;;  %v2384_v39 = vpop.f32.mrb[1].mxu1  ;;  %v2425_v40 = vpop.f32.mrb[5].mxu0 }
 0x65c   : > { %v2452_v41 = vadd.f32 %v2438_v33, %v2384_v39  ;;  %v2454_v42 = vadd.f32 %v2446_v34, %v2425_v40  ;;  %v2386_v43 = vpop.f32.mrb[2].mxu1  ;;  %v2427_v44 = vpop.f32.mrb[6].mxu0 }
 0x65d   : > { %v2792_v45 = vmul.f32 -1.442695, %v2451_v36  ;;  %v2387_v46 = vpop.f32.mrb[3].mxu1  ;;  %v2428_v47 = vpop.f32.mrb[7].mxu0 }
 0x65e   : > { %v2793_v48 = vmul.f32 -1.442695, %v2452_v41  ;;  %v2794_v49 = vmul.f32 -1.442695, %v2454_v42 }
 0x65f   : > { %3332 = vpow2.f32 %v2792_v45 }
 0x660   : > { %3334 = vpow2.f32 %v2793_v48 }
 0x661   : > { %3336 = vpow2.f32 %v2794_v49 }
 0x662   : > { %3338 = vtanh.f32 %v2453_v37 }
 0x669   : > { %v3333_v50 = vpop.eup %3332 }
 0x66a   : > { %v3335_v51 = vpop.eup %3334  ;;  %v2467_v52 = vadd.f32 1.0, %v3333_v50 }
 0x66b   : > { %v2474_v53 = vadd.f32 1.0, %v3335_v51  ;;  %v3337_v54 = vpop.eup %3336 }
 0x66c   : > { %3340 = vrcp.f32 %v2467_v52  ;;  %v3339_v55 = vpop.eup %3338  ;;  %v2483_v60 = vadd.f32 1.0, %v3337_v54 }
 0x66d   : > { %3342 = vrcp.f32 %v2474_v53 }
 0x66e   : > { %3344 = vrcp.f32 %v2483_v60 }
 0x676   : > { %v3341_v57 = vpop.eup %3340 }
 0x677   : > { %v3343_v58 = vpop.eup %3342  ;;  %v2488_v59 = vmul.f32 %v3341_v57, %v3339_v55 }
 0x678   : > { %v2487_v61 = vmul.f32 %v3343_v58, %v2486_v56  ;;  %v3345_v63 = vpop.eup %3344 }
 0x67a   : > { %v2489_v62 = vadd.f32 %v2488_v59, %v2487_v61 }
 0x67c   : > { %2490 = vst [vmem:[#allocation3] sm:$0xff] %v2489_v62  ;;  %3346 = vtanh.f32 %v2489_v62 }
 0x683   :  { %1758 = sbr.rel (!%p1756_p4) target bundleno = 1250 (0x4e2), region = 98 }
 0x686   : > { %v3347_v1 = vpop.eup %3346 }
 0x687   : > { %v2492_v3 = vmul.f32 %v3347_v1, %v3345_v63 }
 0x689   : > { %2493 = vst [vmem:[#allocation2] sm:$0xff] %v2492_v3 }
 0x68a   :  { %3403 = shalt.err (!%p3400_p9)
}
 0x68b   :  { %s3404_s25 = scalar_lea.hbm %s3694_s6, 1024 }
 0x68c   :  { %p3405_p10 = scmp.ne.s32.totalorder %s3694_s6, %s3404_s25  ;;  %p3408_p11 = scmp.lt.u32.totalorder %s3404_s25, %s3694_s6 }
 0x68e   :  { %p3410_p12 = pnand %p3408_p11, %p3405_p10 }
 0x690   :  { %3413 = shalt.err (!%p3410_p12)
}
 0x691   :  { %s3459_s1 = smov 128   ;;  %s3460_s2 = smov 8  }
 0x692   :  { %2505 = dma.vmem_to_hbm [thread:$0]  %s2500_s21, 1024, %s3694_s6, [#allocation7], %s3459_s1, %s3459_s1, %s3460_s2  }
 0x693   :  { %3430 = dma.done.wait [#allocation7], 1024  }
 0x694   :  { %3431 = vsyncadd [#allocation7], 4294966272 }
 0x695   :  { %2509 = vsyncpa [#allocation6], 1 }
 0x696   :  { %2510 = vsyncpa [#allocation9], 1 }
 0x697   :  { %2511 = vsyncpa [#allocation7], 1 }

</bundles_post_ra>
